<compile_context>
chip_gen: v7x
topology: tpu7x:2x2x1
jax: 0.10.0
libtpu: 0.0.40
codegen_flags: <defaults>
</compile_context>

<pallas_src>
import functools

import jax
import jax.numpy as jnp
from jax.experimental import pallas as pl
from jax.experimental.pallas import tpu as pltpu


# ----------------------------- tiling helpers ------------------------------

_VMEM_LIMIT = 40 * 1024 * 1024   # safe everywhere: > v5e's 16 MiB scoped default,
                                 # well under v7x's 64 MiB physical VMEM.


@functools.lru_cache(maxsize=None)
def _prefs():
    """Generation-aware preferred tile sizes."""
    try:
        kind = jax.devices()[0].device_kind.lower()
    except Exception:
        kind = ""
    # v2..v5 have 128x128 MXUs; v6e/v7x have 256x256 -> prefer 256-multiples there.
    mxu = 128 if any(g in kind for g in ("v2", "v3", "v4", "v5")) else 256
    return {"tm": 256, "tn": 768, "ti": 1024, "mxu": mxu}


def _pick_tile(dim, pref, mult):
    """Largest tile <= pref that is a multiple of `mult` and divides `dim`,
    else the full dim (full-extent blocks are always legal)."""
    if dim <= pref:
        return dim
    t = (pref // mult) * mult
    while t >= mult:
        if dim % t == 0:
            return t
        t -= mult
    return dim


def _cparams(dims):
    return pltpu.CompilerParams(dimension_semantics=dims,
                                vmem_limit_bytes=_VMEM_LIMIT)


# ----------------------------- Pallas kernels ------------------------------

def _mm_bias_kernel(x_ref, w_ref, b_ref, o_ref, *, act):
    """Full-K matmul (bf16 x bf16 -> f32) + bias (+ optional GELU); no K grid axis."""
    y = jnp.dot(x_ref[...], w_ref[...],
                preferred_element_type=jnp.float32) + b_ref[...]
    if act == "gelu":
        # TODO(synk): HF bert 'gelu' is erf-exact; tanh-approx used (EUP-friendly).
        y = jax.nn.gelu(y, approximate=True)
    o_ref[...] = y.astype(o_ref.dtype)


def _mm_res_ln_kernel(x_ref, w_ref, b_ref, res_ref, g_ref, bln_ref, o_ref, *, eps):
    """Full-K matmul with fused bias + residual-add + LayerNorm epilogue."""
    y = jnp.dot(x_ref[...], w_ref[...], preferred_element_type=jnp.float32)
    y = y + b_ref[...] + res_ref[...].astype(jnp.float32)
    mean = jnp.mean(y, axis=-1, keepdims=True)
    var = jnp.mean(jnp.square(y - mean), axis=-1, keepdims=True)
    y = (y - mean) * jax.lax.rsqrt(var + eps)
    o_ref[...] = (y * g_ref[...] + bln_ref[...]).astype(o_ref.dtype)


def _mlp_kernel(x_ref, w1_ref, b1_ref, w2_ref, b2_ref, res_ref, g_ref, bln_ref,
                o_ref, acc_ref, *, eps):
    """Fused fc1 + GELU + fc2 + residual + LayerNorm.

    Grid = (M tiles, I tiles); the (M, I) intermediate never leaves VMEM.
    fc2 partials accumulate into a (tm, H) f32 scratch across the I axis.
    """
    j = pl.program_id(1)

    @pl.when(j == 0)
    def _():
        acc_ref[...] = jnp.zeros_like(acc_ref)

    h = jnp.dot(x_ref[...], w1_ref[...],
                preferred_element_type=jnp.float32) + b1_ref[...]
    # TODO(synk): HF bert 'gelu' is erf-exact; tanh-approx used (EUP-friendly).
    h = jax.nn.gelu(h, approximate=True)
    acc_ref[...] += jnp.dot(h.astype(x_ref.dtype), w2_ref[...],
                            preferred_element_type=jnp.float32)

    @pl.when(j == pl.num_programs(1) - 1)
    def _():
        y = acc_ref[...] + b2_ref[...] + res_ref[...].astype(jnp.float32)
        mean = jnp.mean(y, axis=-1, keepdims=True)
        var = jnp.mean(jnp.square(y - mean), axis=-1, keepdims=True)
        y = (y - mean) * jax.lax.rsqrt(var + eps)
        o_ref[...] = (y * g_ref[...] + bln_ref[...]).astype(o_ref.dtype)


def _add_ln_kernel(x_ref, r_ref, g_ref, b_ref, o_ref, *, eps):
    """Fused add + LayerNorm (embeddings). r is the shared (S, H) pos+type slab."""
    x = x_ref[...].astype(jnp.float32) + r_ref[...].astype(jnp.float32)
    mean = jnp.mean(x, axis=-1, keepdims=True)
    var = jnp.mean(jnp.square(x - mean), axis=-1, keepdims=True)
    y = (x - mean) * jax.lax.rsqrt(var + eps)
    o_ref[...] = (y * g_ref[...] + b_ref[...]).astype(o_ref.dtype)


def _attn_heads(q, k, v, bias, n_heads, dh, out_dtype):
    """Shared per-head attention body. q is already scaled by 1/sqrt(dh).
    q/k/v: (S, n_heads*dh) bf16; bias: (1, S) f32 additive mask.
    Softmax normalization is applied AFTER the PV matmul (O(S*dh) multiplies)."""
    outs = []
    for h in range(n_heads):
        qh = q[:, h * dh:(h + 1) * dh]
        kh = k[:, h * dh:(h + 1) * dh]
        vh = v[:, h * dh:(h + 1) * dh]
        s = jax.lax.dot_general(qh, kh, (((1,), (1,)), ((), ())),
                                preferred_element_type=jnp.float32)
        s = s + bias                                        # (S, S)
        m = jnp.max(s, axis=-1, keepdims=True)
        p = jnp.exp(s - m)                                  # unnormalized probs
        denom = jnp.sum(p, axis=-1, keepdims=True)
        ctx = jnp.dot(p.astype(v.dtype), vh, preferred_element_type=jnp.float32)
        ctx = ctx * pl.reciprocal(denom, approx=True)       # normalize (S, dh)
        outs.append(ctx)
    return jnp.concatenate(outs, axis=-1).astype(out_dtype)  # one lane-dense store


def _attn_group_kernel(q_ref, k_ref, v_ref, bias_ref, o_ref, *, hpb, dh, scale):
    """One batch x one head-group per grid step (lane-aligned q/k/v/out blocks)."""
    bias = bias_ref[0]                                       # (1, S)
    q = (q_ref[...].astype(jnp.float32) * scale).astype(q_ref.dtype)
    o_ref[...] = _attn_heads(q, k_ref[...], v_ref[...], bias, hpb, dh, o_ref.dtype)


def _attn_full_kernel(qkv_ref, bias_ref, o_ref, *, nh, dh, scale):
    """Fallback for tiny configs: all heads of one batch per grid step."""
    H = nh * dh
    bias = bias_ref[0]                                       # (1, S)
    q = (qkv_ref[:, :H].astype(jnp.float32) * scale).astype(qkv_ref.dtype)
    k = qkv_ref[:, H:2 * H]
    v = qkv_ref[:, 2 * H:]
    o_ref[...] = _attn_heads(q, k, v, bias, nh, dh, o_ref.dtype)


def _cls_ce_kernel(x_ref, w_ref, b_ref, lab_ref, logits_ref, loss_ref, cnt_ref,
                   *, num_labels):
    """Token classifier (lane-padded to 128) + per-block partial cross-entropy."""
    logits = jnp.dot(x_ref[...], w_ref[...],
                     preferred_element_type=jnp.float32) + b_ref[...]
    logits_ref[...] = logits                                 # (tm, 128) lane-dense

    labels = lab_ref[...]                                    # (tm, 1) int32
    col = jax.lax.broadcasted_iota(jnp.int32, logits.shape, 1)
    masked = jnp.where(col < num_labels, logits, -1e30)      # ignore padded classes
    m = jnp.max(masked, axis=-1, keepdims=True)
    lse = jnp.log(jnp.sum(jnp.exp(masked - m), axis=-1, keepdims=True)) + m
    picked = jnp.sum(jnp.where(col == labels, logits, 0.0), axis=-1, keepdims=True)
    valid = (labels != -100).astype(jnp.float32)
    nll = (lse - picked) * valid
    loss_ref[...] = jnp.sum(nll, axis=(0, 1), keepdims=True)
    cnt_ref[...] = jnp.sum(valid, axis=(0, 1), keepdims=True)


# ----------------------------- wrappers -------------------------------------

def linear_bias(x, w, b, act=None, out_dtype=jnp.bfloat16):
    """x @ w + b (optional GELU).  Grid = (N tiles, M tiles) with M innermost so
    weight tiles stay resident across M (fetched once per N tile)."""
    M, K = x.shape
    _, N = w.shape
    p = _prefs()
    tm = _pick_tile(M, p["tm"], 16)
    tn = _pick_tile(N, p["tn"], p["mxu"])
    kernel = functools.partial(_mm_bias_kernel, act=act)
    return pl.pallas_call(
        kernel,
        out_shape=jax.ShapeDtypeStruct((M, N), out_dtype),
        grid=(N // tn, M // tm),
        in_specs=[pl.BlockSpec((tm, K), lambda j, i: (i, 0)),
                  pl.BlockSpec((K, tn), lambda j, i: (0, j)),
                  pl.BlockSpec((1, tn), lambda j, i: (0, j))],
        out_specs=pl.BlockSpec((tm, tn), lambda j, i: (i, j)),
        compiler_params=_cparams(("parallel", "parallel")),
    )(x, w, b.reshape(1, N))


def linear_res_ln(x, w, b, res, gamma, beta, eps=1e-12, out_dtype=jnp.bfloat16):
    """(x @ w + b + res) -> LayerNorm.  Full K and full N per block (H is small);
    weight block index is constant so it is DMA'd once."""
    M, K = x.shape
    _, N = w.shape
    p = _prefs()
    tm = _pick_tile(M, p["tm"], 16)
    kernel = functools.partial(_mm_res_ln_kernel, eps=eps)
    return pl.pallas_call(
        kernel,
        out_shape=jax.ShapeDtypeStruct((M, N), out_dtype),
        grid=(M // tm,),
        in_specs=[pl.BlockSpec((tm, K), lambda i: (i, 0)),
                  pl.BlockSpec((K, N), lambda i: (0, 0)),
                  pl.BlockSpec((1, N), lambda i: (0, 0)),
                  pl.BlockSpec((tm, N), lambda i: (i, 0)),
                  pl.BlockSpec((1, N), lambda i: (0, 0)),
                  pl.BlockSpec((1, N), lambda i: (0, 0))],
        out_specs=pl.BlockSpec((tm, N), lambda i: (i, 0)),
        compiler_params=_cparams(("parallel",)),
    )(x, w, b.reshape(1, N), res, gamma.reshape(1, N), beta.reshape(1, N))


def mlp_res_ln(x, w1, b1, w2, b2, res, gamma, beta, eps=1e-12,
               out_dtype=jnp.bfloat16):
    """Fused GELU MLP + residual + LayerNorm (no HBM round-trip for the (M, I)
    intermediate).  Grid = (M tiles [parallel], I tiles [arbitrary])."""
    M, H = x.shape
    _, I = w1.shape
    p = _prefs()
    tm = _pick_tile(M, p["tm"], 16)
    ti = _pick_tile(I, p["ti"], p["mxu"])
    kernel = functools.partial(_mlp_kernel, eps=eps)
    return pl.pallas_call(
        kernel,
        out_shape=jax.ShapeDtypeStruct((M, H), out_dtype),
        grid=(M // tm, I // ti),
        in_specs=[pl.BlockSpec((tm, H), lambda i, j: (i, 0)),
                  pl.BlockSpec((H, ti), lambda i, j: (0, j)),
                  pl.BlockSpec((1, ti), lambda i, j: (0, j)),
                  pl.BlockSpec((ti, H), lambda i, j: (j, 0)),
                  pl.BlockSpec((1, H), lambda i, j: (0, 0)),
                  pl.BlockSpec((tm, H), lambda i, j: (i, 0)),
                  pl.BlockSpec((1, H), lambda i, j: (0, 0)),
                  pl.BlockSpec((1, H), lambda i, j: (0, 0))],
        out_specs=pl.BlockSpec((tm, H), lambda i, j: (i, 0)),
        scratch_shapes=[pltpu.VMEM((tm, H), jnp.float32)],
        compiler_params=_cparams(("parallel", "arbitrary")),
    )(x, w1, b1.reshape(1, I), w2, b2.reshape(1, H), res,
      gamma.reshape(1, H), beta.reshape(1, H))


def add_layernorm(word, pos_type, gamma, beta, *, B, S, H, eps=1e-12,
                  out_dtype=jnp.bfloat16):
    """Embedding add + LayerNorm; the (S, H) pos+type slab is never broadcast to
    (M, H) in HBM — it is mapped per batch block by the BlockSpec."""
    kernel = functools.partial(_add_ln_kernel, eps=eps)
    return pl.pallas_call(
        kernel,
        out_shape=jax.ShapeDtypeStruct((B * S, H), out_dtype),
        grid=(B,),
        in_specs=[pl.BlockSpec((S, H), lambda b: (b, 0)),
                  pl.BlockSpec((S, H), lambda b: (0, 0)),
                  pl.BlockSpec((1, H), lambda b: (0, 0)),
                  pl.BlockSpec((1, H), lambda b: (0, 0))],
        out_specs=pl.BlockSpec((S, H), lambda b: (b, 0)),
        compiler_params=_cparams(("parallel",)),
    )(word, pos_type, gamma.reshape(1, H), beta.reshape(1, H))


def attention(qkv, bias, *, B, S, nh, dh, scale, out_dtype=jnp.bfloat16):
    """Multi-head attention on the token-major (B*S, 3H) qkv slab.

    Preferred path: grid = (batch, head-group) where the group's lane width is a
    multiple of 128 (e.g. pairs of 64-wide heads for bert-base), so q/k/v loads
    and the output store are lane-dense and each group's (S,S) intermediates are
    bounded to one grid step.  Tiny configs fall back to all-heads-per-batch."""
    H = nh * dh
    M = B * S

    hpb = None
    for cand in range(1, nh + 1):                    # smallest aligned group
        if nh % cand == 0 and (cand * dh) % 128 == 0:
            hpb = cand
            break

    if hpb is not None:
        w = hpb * dh
        k_off = H // w                               # K part starts at block k_off
        v_off = 2 * H // w
        kernel = functools.partial(_attn_group_kernel, hpb=hpb, dh=dh, scale=scale)
        return pl.pallas_call(
            kernel,
            out_shape=jax.ShapeDtypeStruct((M, H), out_dtype),
            grid=(B, nh // hpb),
            in_specs=[pl.BlockSpec((S, w), lambda b, g: (b, g)),
                      pl.BlockSpec((S, w), lambda b, g: (b, k_off + g)),
                      pl.BlockSpec((S, w), lambda b, g: (b, v_off + g)),
                      pl.BlockSpec((1, 1, S), lambda b, g: (b, 0, 0))],
            out_specs=pl.BlockSpec((S, w), lambda b, g: (b, g)),
            compiler_params=_cparams(("parallel", "parallel")),
        )(qkv, qkv, qkv, bias)

    # Fallback: full qkv lanes per batch (used for the tiny test config).
    kernel = functools.partial(_attn_full_kernel, nh=nh, dh=dh, scale=scale)
    return pl.pallas_call(
        kernel,
        out_shape=jax.ShapeDtypeStruct((M, H), out_dtype),
        grid=(B,),
        in_specs=[pl.BlockSpec((S, 3 * H), lambda b: (b, 0)),
                  pl.BlockSpec((1, 1, S), lambda b: (b, 0, 0))],
        out_specs=pl.BlockSpec((S, H), lambda b: (b, 0)),
        compiler_params=_cparams(("parallel",)),
    )(qkv, bias)


def classifier_ce(x, w_pad, b_pad, labels2d, num_labels):
    """Fused token classifier + per-block partial cross-entropy (reduced in XLA)."""
    M, H = x.shape
    _, NP = w_pad.shape
    p = _prefs()
    tm = _pick_tile(M, p["tm"], 16)
    nblk = M // tm
    kernel = functools.partial(_cls_ce_kernel, num_labels=num_labels)
    return pl.pallas_call(
        kernel,
        out_shape=(jax.ShapeDtypeStruct((M, NP), jnp.float32),
                   jax.ShapeDtypeStruct((nblk, 1), jnp.float32),
                   jax.ShapeDtypeStruct((nblk, 1), jnp.float32)),
        grid=(nblk,),
        in_specs=[pl.BlockSpec((tm, H), lambda i: (i, 0)),
                  pl.BlockSpec((H, NP), lambda i: (0, 0)),
                  pl.BlockSpec((1, NP), lambda i: (0, 0)),
                  pl.BlockSpec((tm, 1), lambda i: (i, 0))],
        out_specs=(pl.BlockSpec((tm, NP), lambda i: (i, 0)),
                   pl.BlockSpec((1, 1), lambda i: (i, 0)),
                   pl.BlockSpec((1, 1), lambda i: (i, 0))),
        compiler_params=_cparams(("parallel",)),
    )(x, w_pad, b_pad.reshape(1, NP), labels2d)


# ----------------------------- model -----------------------------------------

def init_params(key, cfg):
    H, I, V, P, L, NL = (cfg["hidden"], cfg["inter"], cfg["vocab"],
                         cfg["max_pos"], cfg["layers"], cfg["labels"])
    NLP = 128  # classifier lane padding (lane-dense stores)
    keys = iter(jax.random.split(key, 8 + 8 * L))

    def wbf16(shape):
        return (0.02 * jax.random.normal(next(keys), shape)).astype(jnp.bfloat16)

    ones = lambda n: jnp.ones((n,), jnp.float32)
    zeros = lambda n: jnp.zeros((n,), jnp.float32)

    cls_w = jnp.zeros((H, NLP), jnp.bfloat16).at[:, :NL].set(wbf16((H, NL)))

    params = {
        "word_emb": wbf16((V, H)), "pos_emb": wbf16((P, H)), "type_emb": wbf16((2, H)),
        "emb_ln_g": ones(H), "emb_ln_b": zeros(H),
        "cls_w": cls_w, "cls_b": zeros(NLP),
        "layers": [],
    }
    for _ in range(L):
        params["layers"].append({
            # fused Q/K/V projection: concatenated (H, 3H) weight
            "qkv_w": wbf16((H, 3 * H)), "qkv_b": zeros(3 * H),
            "o_w": wbf16((H, H)), "o_b": zeros(H),
            "ln1_g": ones(H), "ln1_b": zeros(H),
            "fc1_w": wbf16((H, I)), "fc1_b": zeros(I),
            "fc2_w": wbf16((I, H)), "fc2_b": zeros(H),
            "ln2_g": ones(H), "ln2_b": zeros(H),
        })
    return params


def bert_forward(params, input_id, mask, label, *, cfg):
    B, S = input_id.shape
    H, nh, NL = cfg["hidden"], cfg["heads"], cfg["labels"]
    dh = H // nh
    M = B * S

    # --- embeddings: vocab gather stays in XLA; add + LayerNorm fused in Pallas ---
    # TODO(synk): vocab-table gather has no clean tiled Pallas equivalent at this
    # scale; kept as jnp.take in the XLA glue.
    word = jnp.take(params["word_emb"], input_id.reshape(-1), axis=0)       # (M, H)
    # token_type_ids default to all-zeros in the HF module -> type_emb[0] only.
    pos_type = (params["pos_emb"][:S].astype(jnp.float32)
                + params["type_emb"][0].astype(jnp.float32))                # (S, H)
    x = add_layernorm(word, pos_type, params["emb_ln_g"], params["emb_ln_b"],
                      B=B, S=S, H=H)

    # --- extended attention mask (additive, finite large-negative to avoid NaNs) ---
    bias = ((1.0 - mask.astype(jnp.float32)) * -1e9).reshape(B, 1, S)

    scale = 1.0 / float(dh) ** 0.5

    for lp in params["layers"]:
        qkv = linear_bias(x, lp["qkv_w"], lp["qkv_b"])                       # (M, 3H)
        ctx = attention(qkv, bias, B=B, S=S, nh=nh, dh=dh, scale=scale)      # (M, H)
        x = linear_res_ln(ctx, lp["o_w"], lp["o_b"], x, lp["ln1_g"], lp["ln1_b"])
        x = mlp_res_ln(x, lp["fc1_w"], lp["fc1_b"], lp["fc2_w"], lp["fc2_b"],
                       x, lp["ln2_g"], lp["ln2_b"])

    # --- fused classifier + CrossEntropyLoss(ignore_index=-100) ---
    logits_pad, loss_parts, cnt_parts = classifier_ce(
        x, params["cls_w"], params["cls_b"],
        label.reshape(-1, 1).astype(jnp.int32), NL)
    # Mean over valid tokens; 0/0 -> NaN matches torch when every label is -100.
    loss = jnp.sum(loss_parts) / jnp.sum(cnt_parts)
    logits = logits_pad[:, :NL].reshape(B, S, NL)
    # return_dict=False with labels -> (loss, logits)
    return loss, logits


# ----------------------------- main -------------------------------------------

if __name__ == "__main__":
    cfg = dict(vocab=100, hidden=32, heads=2, layers=2, inter=128, max_pos=32, labels=7)
    B, S = 2, 8

    key = jax.random.PRNGKey(0)
    k_ids, k_lab, k_par = jax.random.split(key, 3)

    input_id = jax.random.randint(k_ids, (B, S), 0, cfg["vocab"], dtype=jnp.int32)
    mask = jnp.array([[1, 1, 1, 1, 1, 1, 1, 1],
                      [1, 1, 1, 1, 1, 1, 0, 0]], dtype=jnp.int32)
    raw_lab = jax.random.randint(k_lab, (B, S), 0, cfg["labels"], dtype=jnp.int32)
    label = jnp.where(mask == 1, raw_lab, -100)          # ignore_index=-100 on padding

    params = init_params(k_par, cfg)

    fwd = jax.jit(functools.partial(bert_forward, cfg=cfg))
    loss, logits = fwd(params, input_id, mask, label)
    jax.block_until_ready((loss, logits))

    assert loss.shape == () and logits.shape == (B, S, cfg["labels"])
    assert bool(jnp.isfinite(loss)) and bool(jnp.all(jnp.isfinite(logits)))
    print("KERNEL_OK")
</pallas_src>

<mosaic_0001>
module attributes {stable_mosaic.version = 11 : i64} {
  func.func @_mm_bias_kernel(%arg0: i32, %arg1: i32, %arg2: memref<16x32xbf16, #tpu.memory_space<vmem>>, %arg3: memref<32x96xbf16, #tpu.memory_space<vmem>>, %arg4: memref<1x96xf32, #tpu.memory_space<vmem>>, %arg5: memref<16x96xbf16, #tpu.memory_space<vmem>>) attributes {dimension_semantics = [#tpu.dimension_semantics<parallel>, #tpu.dimension_semantics<parallel>], iteration_bounds = array<i64: 1, 1>, scalar_prefetch = 0 : i64, scratch_operands = 0 : i64, tpu.core_type = #tpu.core_type<tc>, window_params = [{transform_indices = @transform_0, window_bounds = array<i64: 16, 32>}, {transform_indices = @transform_1, window_bounds = array<i64: 32, 96>}, {transform_indices = @transform_2, window_bounds = array<i64: 1, 96>}, {transform_indices = @transform_3, window_bounds = array<i64: 16, 96>}]} {
    %c0 = arith.constant 0 : index
    %c0_0 = arith.constant 0 : index
    %0 = vector.load %arg2[%c0, %c0_0] : memref<16x32xbf16, #tpu.memory_space<vmem>>, vector<16x32xbf16>
    %c0_1 = arith.constant 0 : index
    %c0_2 = arith.constant 0 : index
    %1 = vector.load %arg3[%c0_1, %c0_2] : memref<32x96xbf16, #tpu.memory_space<vmem>>, vector<32x96xbf16>
    %cst = arith.constant dense<0.000000e+00> : vector<16x96xf32>
    %2 = tpu.matmul %0, %1, %cst {dimension_numbers = #tpu.dot_dimension_numbers<[1], [0], [0], [1], [0, 0, 1, 1], [], []>} : vector<16x32xbf16>, vector<32x96xbf16>, vector<16x96xf32> -> vector<16x96xf32>
    %c0_3 = arith.constant 0 : index
    %c0_4 = arith.constant 0 : index
    %3 = vector.load %arg4[%c0_3, %c0_4] : memref<1x96xf32, #tpu.memory_space<vmem>>, vector<1x96xf32>
    %4 = vector.broadcast %3 : vector<1x96xf32> to vector<16x96xf32>
    %5 = arith.addf %2, %4 : vector<16x96xf32>
    %6 = arith.truncf %5 : vector<16x96xf32> to vector<16x96xbf16>
    %c0_5 = arith.constant 0 : index
    %c0_6 = arith.constant 0 : index
    %7 = vector.load %arg5[%c0_5, %c0_6] : memref<16x96xbf16, #tpu.memory_space<vmem>>, vector<16x96xbf16>
    tpu.vector_store %arg5[%c0_5, %c0_6], %6 {strides = array<i32>} : memref<16x96xbf16, #tpu.memory_space<vmem>>, vector<16x96xbf16>,
    return
  }
  func.func @transform_0(%arg0: i32, %arg1: i32) -> (i32, i32) {
    %c0_i32 = arith.constant 0 : i32
    %c0_i32_0 = arith.constant 0 : i32
    return %arg1, %c0_i32 : i32, i32
  }
  func.func @transform_1(%arg0: i32, %arg1: i32) -> (i32, i32) {
    %c0_i32 = arith.constant 0 : i32
    %c0_i32_0 = arith.constant 0 : i32
    return %c0_i32, %arg0 : i32, i32
  }
  func.func @transform_2(%arg0: i32, %arg1: i32) -> (i32, i32) {
    %c0_i32 = arith.constant 0 : i32
    %c0_i32_0 = arith.constant 0 : i32
    return %c0_i32, %arg0 : i32, i32
  }
  func.func @transform_3(%arg0: i32, %arg1: i32) -> (i32, i32) {
    %c0_i32 = arith.constant 0 : i32
    return %arg1, %arg0 : i32, i32
  }
}

module attributes {stable_mosaic.version = 11 : i64} {
  func.func @_mm_res_ln_kernel(%arg0: i32, %arg1: memref<16x32xbf16, #tpu.memory_space<vmem>>, %arg2: memref<32x32xbf16, #tpu.memory_space<vmem>>, %arg3: memref<1x32xf32, #tpu.memory_space<vmem>>, %arg4: memref<16x32xbf16, #tpu.memory_space<vmem>>, %arg5: memref<1x32xf32, #tpu.memory_space<vmem>>, %arg6: memref<1x32xf32, #tpu.memory_space<vmem>>, %arg7: memref<16x32xbf16, #tpu.memory_space<vmem>>) attributes {dimension_semantics = [#tpu.dimension_semantics<parallel>], iteration_bounds = array<i64: 1>, scalar_prefetch = 0 : i64, scratch_operands = 0 : i64, tpu.core_type = #tpu.core_type<tc>, window_params = [{transform_indices = @transform_0, window_bounds = array<i64: 16, 32>}, {pipeline_mode = #tpu.pipeline_mode<synchronous>, transform_indices = @transform_1, window_bounds = array<i64: 32, 32>}, {pipeline_mode = #tpu.pipeline_mode<synchronous>, transform_indices = @transform_2, window_bounds = array<i64: 1, 32>}, {transform_indices = @transform_3, window_bounds = array<i64: 16, 32>}, {pipeline_mode = #tpu.pipeline_mode<synchronous>, transform_indices = @transform_4, window_bounds = array<i64: 1, 32>}, {pipeline_mode = #tpu.pipeline_mode<synchronous>, transform_indices = @transform_5, window_bounds = array<i64: 1, 32>}, {transform_indices = @transform_6, window_bounds = array<i64: 16, 32>}]} {
    %c0 = arith.constant 0 : index
    %c0_0 = arith.constant 0 : index
    %0 = vector.load %arg1[%c0, %c0_0] : memref<16x32xbf16, #tpu.memory_space<vmem>>, vector<16x32xbf16>
    %c0_1 = arith.constant 0 : index
    %c0_2 = arith.constant 0 : index
    %1 = vector.load %arg2[%c0_1, %c0_2] : memref<32x32xbf16, #tpu.memory_space<vmem>>, vector<32x32xbf16>
    %cst = arith.constant dense<0.000000e+00> : vector<16x32xf32>
    %2 = tpu.matmul %0, %1, %cst {dimension_numbers = #tpu.dot_dimension_numbers<[1], [0], [0], [1], [0, 0, 1, 1], [], []>} : vector<16x32xbf16>, vector<32x32xbf16>, vector<16x32xf32> -> vector<16x32xf32>
    %c0_3 = arith.constant 0 : index
    %c0_4 = arith.constant 0 : index
    %3 = vector.load %arg3[%c0_3, %c0_4] : memref<1x32xf32, #tpu.memory_space<vmem>>, vector<1x32xf32>
    %4 = vector.broadcast %3 : vector<1x32xf32> to vector<16x32xf32>
    %5 = arith.addf %2, %4 : vector<16x32xf32>
    %c0_5 = arith.constant 0 : index
    %c0_6 = arith.constant 0 : index
    %6 = vector.load %arg4[%c0_5, %c0_6] : memref<16x32xbf16, #tpu.memory_space<vmem>>, vector<16x32xbf16>
    %7 = arith.extf %6 : vector<16x32xbf16> to vector<16x32xf32>
    %8 = arith.addf %5, %7 : vector<16x32xf32>
    %cst_7 = arith.constant dense<0.000000e+00> : vector<16xf32>
    %9 = vector.multi_reduction <add>, %8, %cst_7 [1] : vector<16x32xf32> to vector<16xf32>
    %10 = vector.shape_cast %9 : vector<16xf32> to vector<16x1xf32>
    %cst_8 = arith.constant 3.200000e+01 : f32
    %11 = vector.broadcast %cst_8 : f32 to vector<16x1xf32>
    %12 = arith.divf %10, %11 : vector<16x1xf32>
    %13 = vector.broadcast %12 : vector<16x1xf32> to vector<16x32xf32>
    %14 = arith.subf %8, %13 : vector<16x32xf32>
    %15 = arith.mulf %14, %14 : vector<16x32xf32>
    %cst_9 = arith.constant dense<0.000000e+00> : vector<16xf32>
    %16 = vector.multi_reduction <add>, %15, %cst_9 [1] : vector<16x32xf32> to vector<16xf32>
    %17 = vector.shape_cast %16 : vector<16xf32> to vector<16x1xf32>
    %cst_10 = arith.constant 3.200000e+01 : f32
    %18 = vector.broadcast %cst_10 : f32 to vector<16x1xf32>
    %19 = arith.divf %17, %18 : vector<16x1xf32>
    %20 = vector.broadcast %12 : vector<16x1xf32> to vector<16x32xf32>
    %21 = arith.subf %8, %20 : vector<16x32xf32>
    %cst_11 = arith.constant 9.99999996E-13 : f32
    %22 = vector.broadcast %cst_11 : f32 to vector<16x1xf32>
    %23 = arith.addf %19, %22 : vector<16x1xf32>
    %24 = math.rsqrt %23 : vector<16x1xf32>
    %25 = vector.broadcast %24 : vector<16x1xf32> to vector<16x32xf32>
    %26 = arith.mulf %21, %25 : vector<16x32xf32>
    %c0_12 = arith.constant 0 : index
    %c0_13 = arith.constant 0 : index
    %27 = vector.load %arg5[%c0_12, %c0_13] : memref<1x32xf32, #tpu.memory_space<vmem>>, vector<1x32xf32>
    %28 = vector.broadcast %27 : vector<1x32xf32> to vector<16x32xf32>
    %29 = arith.mulf %26, %28 : vector<16x32xf32>
    %c0_14 = arith.constant 0 : index
    %c0_15 = arith.constant 0 : index
    %30 = vector.load %arg6[%c0_14, %c0_15] : memref<1x32xf32, #tpu.memory_space<vmem>>, vector<1x32xf32>
    %31 = vector.broadcast %30 : vector<1x32xf32> to vector<16x32xf32>
    %32 = arith.addf %29, %31 : vector<16x32xf32>
    %33 = arith.truncf %32 : vector<16x32xf32> to vector<16x32xbf16>
    %c0_16 = arith.constant 0 : index
    %c0_17 = arith.constant 0 : index
    %34 = vector.load %arg7[%c0_16, %c0_17] : memref<16x32xbf16, #tpu.memory_space<vmem>>, vector<16x32xbf16>
    tpu.vector_store %arg7[%c0_16, %c0_17], %33 {strides = array<i32>} : memref<16x32xbf16, #tpu.memory_space<vmem>>, vector<16x32xbf16>,
    return
  }
  func.func @transform_0(%arg0: i32) -> (i32, i32) {
    %c0_i32 = arith.constant 0 : i32
    %c0_i32_0 = arith.constant 0 : i32
    return %arg0, %c0_i32 : i32, i32
  }
  func.func @transform_1(%arg0: i32) -> (i32, i32) {
    %c0_i32 = arith.constant 0 : i32
    %c0_i32_0 = arith.constant 0 : i32
    %c0_i32_1 = arith.constant 0 : i32
    return %c0_i32, %c0_i32_0 : i32, i32
  }
  func.func @transform_2(%arg0: i32) -> (i32, i32) {
    %c0_i32 = arith.constant 0 : i32
    %c0_i32_0 = arith.constant 0 : i32
    %c0_i32_1 = arith.constant 0 : i32
    return %c0_i32, %c0_i32_0 : i32, i32
  }
  func.func @transform_3(%arg0: i32) -> (i32, i32) {
    %c0_i32 = arith.constant 0 : i32
    %c0_i32_0 = arith.constant 0 : i32
    return %arg0, %c0_i32 : i32, i32
  }
  func.func @transform_4(%arg0: i32) -> (i32, i32) {
    %c0_i32 = arith.constant 0 : i32
    %c0_i32_0 = arith.constant 0 : i32
    %c0_i32_1 = arith.constant 0 : i32
    return %c0_i32, %c0_i32_0 : i32, i32
  }
  func.func @transform_5(%arg0: i32) -> (i32, i32) {
    %c0_i32 = arith.constant 0 : i32
    %c0_i32_0 = arith.constant 0 : i32
    %c0_i32_1 = arith.constant 0 : i32
    return %c0_i32, %c0_i32_0 : i32, i32
  }
  func.func @transform_6(%arg0: i32) -> (i32, i32) {
    %c0_i32 = arith.constant 0 : i32
    %c0_i32_0 = arith.constant 0 : i32
    return %arg0, %c0_i32 : i32, i32
  }
}

module attributes {stable_mosaic.version = 11 : i64} {
  func.func @_attn_full_kernel(%arg0: i32, %arg1: memref<8x96xbf16, #tpu.memory_space<vmem>>, %arg2: memref<1x1x8xf32, #tpu.memory_space<vmem>>, %arg3: memref<8x32xbf16, #tpu.memory_space<vmem>>) attributes {dimension_semantics = [#tpu.dimension_semantics<parallel>], iteration_bounds = array<i64: 2>, scalar_prefetch = 0 : i64, scratch_operands = 0 : i64, tpu.core_type = #tpu.core_type<tc>, window_params = [{transform_indices = @transform_0, window_bounds = array<i64: 8, 96>}, {transform_indices = @transform_1, window_bounds = array<i64: 1, 1, 8>}, {transform_indices = @transform_2, window_bounds = array<i64: 8, 32>}]} {
    %c0 = arith.constant 0 : index
    %c0_0 = arith.constant 0 : index
    %c0_1 = arith.constant 0 : index
    %0 = vector.load %arg2[%c0, %c0_0, %c0_1] : memref<1x1x8xf32, #tpu.memory_space<vmem>>, vector<1x1x8xf32>
    %1 = vector.shape_cast %0 : vector<1x1x8xf32> to vector<1x8xf32>
    %c0_2 = arith.constant 0 : index
    %c0_3 = arith.constant 0 : index
    %2 = vector.load %arg1[%c0_2, %c0_3] : memref<8x96xbf16, #tpu.memory_space<vmem>>, vector<8x32xbf16>
    %3 = arith.extf %2 : vector<8x32xbf16> to vector<8x32xf32>
    %cst = arith.constant 2.500000e-01 : f32
    %4 = vector.broadcast %cst : f32 to vector<8x32xf32>
    %5 = arith.mulf %3, %4 : vector<8x32xf32>
    %6 = arith.truncf %5 : vector<8x32xf32> to vector<8x32xbf16>
    %c0_4 = arith.constant 0 : index
    %c32 = arith.constant 32 : index
    %7 = vector.load %arg1[%c0_4, %c32] : memref<8x96xbf16, #tpu.memory_space<vmem>>, vector<8x32xbf16>
    %c0_5 = arith.constant 0 : index
    %c64 = arith.constant 64 : index
    %8 = vector.load %arg1[%c0_5, %c64] : memref<8x96xbf16, #tpu.memory_space<vmem>>, vector<8x32xbf16>
    %9 = vector.extract_strided_slice %6 {offsets = [0, 0], sizes = [8, 16], strides = [1, 1]} : vector<8x32xbf16> to vector<8x16xbf16>
    %10 = vector.extract_strided_slice %7 {offsets = [0, 0], sizes = [8, 16], strides = [1, 1]} : vector<8x32xbf16> to vector<8x16xbf16>
    %11 = vector.extract_strided_slice %8 {offsets = [0, 0], sizes = [8, 16], strides = [1, 1]} : vector<8x32xbf16> to vector<8x16xbf16>
    %cst_6 = arith.constant dense<0.000000e+00> : vector<8x8xf32>
    %12 = tpu.matmul %9, %10, %cst_6 {dimension_numbers = #tpu.dot_dimension_numbers<[1], [1], [0], [0], [0, 0, 1, 0], [], []>} : vector<8x16xbf16>, vector<8x16xbf16>, vector<8x8xf32> -> vector<8x8xf32>
    %13 = vector.broadcast %1 : vector<1x8xf32> to vector<8x8xf32>
    %14 = arith.addf %12, %13 : vector<8x8xf32>
    %cst_7 = arith.constant dense<0xFF800000> : vector<8xf32>
    %15 = vector.multi_reduction <maximumf>, %14, %cst_7 [1] : vector<8x8xf32> to vector<8xf32>
    %16 = vector.shape_cast %15 : vector<8xf32> to vector<8x1xf32>
    %17 = vector.broadcast %16 : vector<8x1xf32> to vector<8x8xf32>
    %18 = arith.subf %14, %17 : vector<8x8xf32>
    %19 = math.exp %18 : vector<8x8xf32>
    %cst_8 = arith.constant dense<0.000000e+00> : vector<8xf32>
    %20 = vector.multi_reduction <add>, %19, %cst_8 [1] : vector<8x8xf32> to vector<8xf32>
    %21 = vector.shape_cast %20 : vector<8xf32> to vector<8x1xf32>
    %22 = arith.truncf %19 : vector<8x8xf32> to vector<8x8xbf16>
    %cst_9 = arith.constant dense<0.000000e+00> : vector<8x16xf32>
    %23 = tpu.matmul %22, %11, %cst_9 {dimension_numbers = #tpu.dot_dimension_numbers<[1], [0], [0], [1], [0, 0, 1, 1], [], []>} : vector<8x8xbf16>, vector<8x16xbf16>, vector<8x16xf32> -> vector<8x16xf32>
    %24 = tpu.reciprocal %21 {approx = true} : vector<8x1xf32> -> vector<8x1xf32>
    %25 = vector.broadcast %24 : vector<8x1xf32> to vector<8x16xf32>
    %26 = arith.mulf %23, %25 : vector<8x16xf32>
    %27 = vector.extract_strided_slice %6 {offsets = [0, 16], sizes = [8, 16], strides = [1, 1]} : vector<8x32xbf16> to vector<8x16xbf16>
    %28 = vector.extract_strided_slice %7 {offsets = [0, 16], sizes = [8, 16], strides = [1, 1]} : vector<8x32xbf16> to vector<8x16xbf16>
    %29 = vector.extract_strided_slice %8 {offsets = [0, 16], sizes = [8, 16], strides = [1, 1]} : vector<8x32xbf16> to vector<8x16xbf16>
    %cst_10 = arith.constant dense<0.000000e+00> : vector<8x8xf32>
    %30 = tpu.matmul %27, %28, %cst_10 {dimension_numbers = #tpu.dot_dimension_numbers<[1], [1], [0], [0], [0, 0, 1, 0], [], []>} : vector<8x16xbf16>, vector<8x16xbf16>, vector<8x8xf32> -> vector<8x8xf32>
    %31 = vector.broadcast %1 : vector<1x8xf32> to vector<8x8xf32>
    %32 = arith.addf %30, %31 : vector<8x8xf32>
    %cst_11 = arith.constant dense<0xFF800000> : vector<8xf32>
    %33 = vector.multi_reduction <maximumf>, %32, %cst_11 [1] : vector<8x8xf32> to vector<8xf32>
    %34 = vector.shape_cast %33 : vector<8xf32> to vector<8x1xf32>
    %35 = vector.broadcast %34 : vector<8x1xf32> to vector<8x8xf32>
    %36 = arith.subf %32, %35 : vector<8x8xf32>
    %37 = math.exp %36 : vector<8x8xf32>
    %cst_12 = arith.constant dense<0.000000e+00> : vector<8xf32>
    %38 = vector.multi_reduction <add>, %37, %cst_12 [1] : vector<8x8xf32> to vector<8xf32>
    %39 = vector.shape_cast %38 : vector<8xf32> to vector<8x1xf32>
    %40 = arith.truncf %37 : vector<8x8xf32> to vector<8x8xbf16>
    %cst_13 = arith.constant dense<0.000000e+00> : vector<8x16xf32>
    %41 = tpu.matmul %40, %29, %cst_13 {dimension_numbers = #tpu.dot_dimension_numbers<[1], [0], [0], [1], [0, 0, 1, 1], [], []>} : vector<8x8xbf16>, vector<8x16xbf16>, vector<8x16xf32> -> vector<8x16xf32>
    %42 = tpu.reciprocal %39 {approx = true} : vector<8x1xf32> -> vector<8x1xf32>
    %43 = vector.broadcast %42 : vector<8x1xf32> to vector<8x16xf32>
    %44 = arith.mulf %41, %43 : vector<8x16xf32>
    %45 = tpu.concatenate %26, %44 in 1 : vector<8x16xf32>, vector<8x16xf32> -> vector<8x32xf32>
    %46 = arith.truncf %45 : vector<8x32xf32> to vector<8x32xbf16>
    %c0_14 = arith.constant 0 : index
    %c0_15 = arith.constant 0 : index
    %47 = vector.load %arg3[%c0_14, %c0_15] : memref<8x32xbf16, #tpu.memory_space<vmem>>, vector<8x32xbf16>
    tpu.vector_store %arg3[%c0_14, %c0_15], %46 {strides = array<i32>} : memref<8x32xbf16, #tpu.memory_space<vmem>>, vector<8x32xbf16>,
    return
  }
  func.func @transform_0(%arg0: i32) -> (i32, i32) {
    %c0_i32 = arith.constant 0 : i32
    %c0_i32_0 = arith.constant 0 : i32
    return %arg0, %c0_i32 : i32, i32
  }
  func.func @transform_1(%arg0: i32) -> (i32, i32, i32) {
    %c0_i32 = arith.constant 0 : i32
    %c0_i32_0 = arith.constant 0 : i32
    %c0_i32_1 = arith.constant 0 : i32
    return %arg0, %c0_i32, %c0_i32_0 : i32, i32, i32
  }
  func.func @transform_2(%arg0: i32) -> (i32, i32) {
    %c0_i32 = arith.constant 0 : i32
    %c0_i32_0 = arith.constant 0 : i32
    return %arg0, %c0_i32 : i32, i32
  }
}

module attributes {stable_mosaic.version = 11 : i64} {
  func.func @_add_ln_kernel(%arg0: i32, %arg1: memref<8x32xbf16, #tpu.memory_space<vmem>>, %arg2: memref<8x32xf32, #tpu.memory_space<vmem>>, %arg3: memref<1x32xf32, #tpu.memory_space<vmem>>, %arg4: memref<1x32xf32, #tpu.memory_space<vmem>>, %arg5: memref<8x32xbf16, #tpu.memory_space<vmem>>) attributes {dimension_semantics = [#tpu.dimension_semantics<parallel>], iteration_bounds = array<i64: 2>, scalar_prefetch = 0 : i64, scratch_operands = 0 : i64, tpu.core_type = #tpu.core_type<tc>, window_params = [{transform_indices = @transform_0, window_bounds = array<i64: 8, 32>}, {pipeline_mode = #tpu.pipeline_mode<synchronous>, transform_indices = @transform_1, window_bounds = array<i64: 8, 32>}, {pipeline_mode = #tpu.pipeline_mode<synchronous>, transform_indices = @transform_2, window_bounds = array<i64: 1, 32>}, {pipeline_mode = #tpu.pipeline_mode<synchronous>, transform_indices = @transform_3, window_bounds = array<i64: 1, 32>}, {transform_indices = @transform_4, window_bounds = array<i64: 8, 32>}]} {
    %c0 = arith.constant 0 : index
    %c0_0 = arith.constant 0 : index
    %0 = vector.load %arg1[%c0, %c0_0] : memref<8x32xbf16, #tpu.memory_space<vmem>>, vector<8x32xbf16>
    %1 = arith.extf %0 : vector<8x32xbf16> to vector<8x32xf32>
    %c0_1 = arith.constant 0 : index
    %c0_2 = arith.constant 0 : index
    %2 = vector.load %arg2[%c0_1, %c0_2] : memref<8x32xf32, #tpu.memory_space<vmem>>, vector<8x32xf32>
    %3 = arith.addf %1, %2 : vector<8x32xf32>
    %cst = arith.constant dense<0.000000e+00> : vector<8xf32>
    %4 = vector.multi_reduction <add>, %3, %cst [1] : vector<8x32xf32> to vector<8xf32>
    %5 = vector.shape_cast %4 : vector<8xf32> to vector<8x1xf32>
    %cst_3 = arith.constant 3.200000e+01 : f32
    %6 = vector.broadcast %cst_3 : f32 to vector<8x1xf32>
    %7 = arith.divf %5, %6 : vector<8x1xf32>
    %8 = vector.broadcast %7 : vector<8x1xf32> to vector<8x32xf32>
    %9 = arith.subf %3, %8 : vector<8x32xf32>
    %10 = arith.mulf %9, %9 : vector<8x32xf32>
    %cst_4 = arith.constant dense<0.000000e+00> : vector<8xf32>
    %11 = vector.multi_reduction <add>, %10, %cst_4 [1] : vector<8x32xf32> to vector<8xf32>
    %12 = vector.shape_cast %11 : vector<8xf32> to vector<8x1xf32>
    %cst_5 = arith.constant 3.200000e+01 : f32
    %13 = vector.broadcast %cst_5 : f32 to vector<8x1xf32>
    %14 = arith.divf %12, %13 : vector<8x1xf32>
    %15 = vector.broadcast %7 : vector<8x1xf32> to vector<8x32xf32>
    %16 = arith.subf %3, %15 : vector<8x32xf32>
    %cst_6 = arith.constant 9.99999996E-13 : f32
    %17 = vector.broadcast %cst_6 : f32 to vector<8x1xf32>
    %18 = arith.addf %14, %17 : vector<8x1xf32>
    %19 = math.rsqrt %18 : vector<8x1xf32>
    %20 = vector.broadcast %19 : vector<8x1xf32> to vector<8x32xf32>
    %21 = arith.mulf %16, %20 : vector<8x32xf32>
    %c0_7 = arith.constant 0 : index
    %c0_8 = arith.constant 0 : index
    %22 = vector.load %arg3[%c0_7, %c0_8] : memref<1x32xf32, #tpu.memory_space<vmem>>, vector<1x32xf32>
    %23 = vector.broadcast %22 : vector<1x32xf32> to vector<8x32xf32>
    %24 = arith.mulf %21, %23 : vector<8x32xf32>
    %c0_9 = arith.constant 0 : index
    %c0_10 = arith.constant 0 : index
    %25 = vector.load %arg4[%c0_9, %c0_10] : memref<1x32xf32, #tpu.memory_space<vmem>>, vector<1x32xf32>
    %26 = vector.broadcast %25 : vector<1x32xf32> to vector<8x32xf32>
    %27 = arith.addf %24, %26 : vector<8x32xf32>
    %28 = arith.truncf %27 : vector<8x32xf32> to vector<8x32xbf16>
    %c0_11 = arith.constant 0 : index
    %c0_12 = arith.constant 0 : index
    %29 = vector.load %arg5[%c0_11, %c0_12] : memref<8x32xbf16, #tpu.memory_space<vmem>>, vector<8x32xbf16>
    tpu.vector_store %arg5[%c0_11, %c0_12], %28 {strides = array<i32>} : memref<8x32xbf16, #tpu.memory_space<vmem>>, vector<8x32xbf16>,
    return
  }
  func.func @transform_0(%arg0: i32) -> (i32, i32) {
    %c0_i32 = arith.constant 0 : i32
    %c0_i32_0 = arith.constant 0 : i32
    return %arg0, %c0_i32 : i32, i32
  }
  func.func @transform_1(%arg0: i32) -> (i32, i32) {
    %c0_i32 = arith.constant 0 : i32
    %c0_i32_0 = arith.constant 0 : i32
    %c0_i32_1 = arith.constant 0 : i32
    return %c0_i32, %c0_i32_0 : i32, i32
  }
  func.func @transform_2(%arg0: i32) -> (i32, i32) {
    %c0_i32 = arith.constant 0 : i32
    %c0_i32_0 = arith.constant 0 : i32
    %c0_i32_1 = arith.constant 0 : i32
    return %c0_i32, %c0_i32_0 : i32, i32
  }
  func.func @transform_3(%arg0: i32) -> (i32, i32) {
    %c0_i32 = arith.constant 0 : i32
    %c0_i32_0 = arith.constant 0 : i32
    %c0_i32_1 = arith.constant 0 : i32
    return %c0_i32, %c0_i32_0 : i32, i32
  }
  func.func @transform_4(%arg0: i32) -> (i32, i32) {
    %c0_i32 = arith.constant 0 : i32
    %c0_i32_0 = arith.constant 0 : i32
    return %arg0, %c0_i32 : i32, i32
  }
}

module attributes {stable_mosaic.version = 11 : i64} {
  func.func @_mlp_kernel(%arg0: i32, %arg1: i32, %arg2: memref<16x32xbf16, #tpu.memory_space<vmem>>, %arg3: memref<32x128xbf16, #tpu.memory_space<vmem>>, %arg4: memref<1x128xf32, #tpu.memory_space<vmem>>, %arg5: memref<128x32xbf16, #tpu.memory_space<vmem>>, %arg6: memref<1x32xf32, #tpu.memory_space<vmem>>, %arg7: memref<16x32xbf16, #tpu.memory_space<vmem>>, %arg8: memref<1x32xf32, #tpu.memory_space<vmem>>, %arg9: memref<1x32xf32, #tpu.memory_space<vmem>>, %arg10: memref<16x32xbf16, #tpu.memory_space<vmem>>, %arg11: memref<16x32xf32, #tpu.memory_space<vmem>>) attributes {dimension_semantics = [#tpu.dimension_semantics<parallel>, #tpu.dimension_semantics<arbitrary>], iteration_bounds = array<i64: 1, 1>, scalar_prefetch = 0 : i64, scratch_operands = 1 : i64, tpu.core_type = #tpu.core_type<tc>, window_params = [{transform_indices = @transform_0, window_bounds = array<i64: 16, 32>}, {transform_indices = @transform_1, window_bounds = array<i64: 32, 128>}, {transform_indices = @transform_2, window_bounds = array<i64: 1, 128>}, {transform_indices = @transform_3, window_bounds = array<i64: 128, 32>}, {pipeline_mode = #tpu.pipeline_mode<synchronous>, transform_indices = @transform_4, window_bounds = array<i64: 1, 32>}, {transform_indices = @transform_5, window_bounds = array<i64: 16, 32>}, {pipeline_mode = #tpu.pipeline_mode<synchronous>, transform_indices = @transform_6, window_bounds = array<i64: 1, 32>}, {pipeline_mode = #tpu.pipeline_mode<synchronous>, transform_indices = @transform_7, window_bounds = array<i64: 1, 32>}, {transform_indices = @transform_8, window_bounds = array<i64: 16, 32>}]} {
    %c0_i32 = arith.constant 0 : i32
    %0 = arith.cmpi eq, %arg1, %c0_i32 : i32
    %1 = arith.extui %0 : i1 to i32
    %c0_i32_0 = arith.constant 0 : i32
    %2 = arith.cmpi ne, %1, %c0_i32_0 : i32
    scf.if %2 {
      %cst_19 = arith.constant 0.000000e+00 : f32
      %31 = vector.broadcast %cst_19 : f32 to vector<16x32xf32>
      %c0_20 = arith.constant 0 : index
      %c0_21 = arith.constant 0 : index
      %32 = vector.load %arg11[%c0_20, %c0_21] : memref<16x32xf32, #tpu.memory_space<vmem>>, vector<16x32xf32>
      tpu.vector_store %arg11[%c0_20, %c0_21], %31 {strides = array<i32>} : memref<16x32xf32, #tpu.memory_space<vmem>>, vector<16x32xf32>,
    } else {
    }
    %c0 = arith.constant 0 : index
    %c0_1 = arith.constant 0 : index
    %3 = vector.load %arg2[%c0, %c0_1] : memref<16x32xbf16, #tpu.memory_space<vmem>>, vector<16x32xbf16>
    %c0_2 = arith.constant 0 : index
    %c0_3 = arith.constant 0 : index
    %4 = vector.load %arg3[%c0_2, %c0_3] : memref<32x128xbf16, #tpu.memory_space<vmem>>, vector<32x128xbf16>
    %cst = arith.constant dense<0.000000e+00> : vector<16x128xf32>
    %5 = tpu.matmul %3, %4, %cst {dimension_numbers = #tpu.dot_dimension_numbers<[1], [0], [0], [1], [0, 0, 1, 1], [], []>} : vector<16x32xbf16>, vector<32x128xbf16>, vector<16x128xf32> -> vector<16x128xf32>
    %c0_4 = arith.constant 0 : index
    %c0_5 = arith.constant 0 : index
    %6 = vector.load %arg4[%c0_4, %c0_5] : memref<1x128xf32, #tpu.memory_space<vmem>>, vector<1x128xf32>
    %7 = vector.broadcast %6 : vector<1x128xf32> to vector<16x128xf32>
    %8 = arith.addf %5, %7 : vector<16x128xf32>
    %9 = arith.mulf %8, %8 : vector<16x128xf32>
    %10 = arith.mulf %8, %9 : vector<16x128xf32>
    %cst_6 = arith.constant 4.471500e-02 : f32
    %11 = vector.broadcast %cst_6 : f32 to vector<16x128xf32>
    %12 = arith.mulf %11, %10 : vector<16x128xf32>
    %13 = arith.addf %8, %12 : vector<16x128xf32>
    %cst_7 = arith.constant 0.797884583 : f32
    %14 = vector.broadcast %cst_7 : f32 to vector<16x128xf32>
    %15 = arith.mulf %14, %13 : vector<16x128xf32>
    %16 = math.tanh %15 : vector<16x128xf32>
    %cst_8 = arith.constant 1.000000e+00 : f32
    %17 = vector.broadcast %cst_8 : f32 to vector<16x128xf32>
    %18 = arith.addf %17, %16 : vector<16x128xf32>
    %cst_9 = arith.constant 5.000000e-01 : f32
    %19 = vector.broadcast %cst_9 : f32 to vector<16x128xf32>
    %20 = arith.mulf %19, %18 : vector<16x128xf32>
    %21 = arith.mulf %8, %20 : vector<16x128xf32>
    %c0_10 = arith.constant 0 : index
    %c0_11 = arith.constant 0 : index
    %22 = vector.load %arg11[%c0_10, %c0_11] : memref<16x32xf32, #tpu.memory_space<vmem>>, vector<16x32xf32>
    %23 = arith.truncf %21 : vector<16x128xf32> to vector<16x128xbf16>
    %c0_12 = arith.constant 0 : index
    %c0_13 = arith.constant 0 : index
    %24 = vector.load %arg5[%c0_12, %c0_13] : memref<128x32xbf16, #tpu.memory_space<vmem>>, vector<128x32xbf16>
    %cst_14 = arith.constant dense<0.000000e+00> : vector<16x32xf32>
    %25 = tpu.matmul %23, %24, %cst_14 {dimension_numbers = #tpu.dot_dimension_numbers<[1], [0], [0], [1], [0, 0, 1, 1], [], []>} : vector<16x128xbf16>, vector<128x32xbf16>, vector<16x32xf32> -> vector<16x32xf32>
    %26 = arith.addf %22, %25 : vector<16x32xf32>
    %c0_15 = arith.constant 0 : index
    %c0_16 = arith.constant 0 : index
    %27 = vector.load %arg11[%c0_15, %c0_16] : memref<16x32xf32, #tpu.memory_space<vmem>>, vector<16x32xf32>
    tpu.vector_store %arg11[%c0_15, %c0_16], %26 {strides = array<i32>} : memref<16x32xf32, #tpu.memory_space<vmem>>, vector<16x32xf32>,
    %c0_i32_17 = arith.constant 0 : i32
    %28 = arith.cmpi eq, %arg1, %c0_i32_17 : i32
    %29 = arith.extui %28 : i1 to i32
    %c0_i32_18 = arith.constant 0 : i32
    %30 = arith.cmpi ne, %29, %c0_i32_18 : i32
    scf.if %30 {
      %c0_19 = arith.constant 0 : index
      %c0_20 = arith.constant 0 : index
      %31 = vector.load %arg11[%c0_19, %c0_20] : memref<16x32xf32, #tpu.memory_space<vmem>>, vector<16x32xf32>
      %c0_21 = arith.constant 0 : index
      %c0_22 = arith.constant 0 : index
      %32 = vector.load %arg6[%c0_21, %c0_22] : memref<1x32xf32, #tpu.memory_space<vmem>>, vector<1x32xf32>
      %33 = vector.broadcast %32 : vector<1x32xf32> to vector<16x32xf32>
      %34 = arith.addf %31, %33 : vector<16x32xf32>
      %c0_23 = arith.constant 0 : index
      %c0_24 = arith.constant 0 : index
      %35 = vector.load %arg7[%c0_23, %c0_24] : memref<16x32xbf16, #tpu.memory_space<vmem>>, vector<16x32xbf16>
      %36 = arith.extf %35 : vector<16x32xbf16> to vector<16x32xf32>
      %37 = arith.addf %34, %36 : vector<16x32xf32>
      %cst_25 = arith.constant dense<0.000000e+00> : vector<16xf32>
      %38 = vector.multi_reduction <add>, %37, %cst_25 [1] : vector<16x32xf32> to vector<16xf32>
      %39 = vector.shape_cast %38 : vector<16xf32> to vector<16x1xf32>
      %cst_26 = arith.constant 3.200000e+01 : f32
      %40 = vector.broadcast %cst_26 : f32 to vector<16x1xf32>
      %41 = arith.divf %39, %40 : vector<16x1xf32>
      %42 = vector.broadcast %41 : vector<16x1xf32> to vector<16x32xf32>
      %43 = arith.subf %37, %42 : vector<16x32xf32>
      %44 = arith.mulf %43, %43 : vector<16x32xf32>
      %cst_27 = arith.constant dense<0.000000e+00> : vector<16xf32>
      %45 = vector.multi_reduction <add>, %44, %cst_27 [1] : vector<16x32xf32> to vector<16xf32>
      %46 = vector.shape_cast %45 : vector<16xf32> to vector<16x1xf32>
      %cst_28 = arith.constant 3.200000e+01 : f32
      %47 = vector.broadcast %cst_28 : f32 to vector<16x1xf32>
      %48 = arith.divf %46, %47 : vector<16x1xf32>
      %49 = vector.broadcast %41 : vector<16x1xf32> to vector<16x32xf32>
      %50 = arith.subf %37, %49 : vector<16x32xf32>
      %cst_29 = arith.constant 9.99999996E-13 : f32
      %51 = vector.broadcast %cst_29 : f32 to vector<16x1xf32>
      %52 = arith.addf %48, %51 : vector<16x1xf32>
      %53 = math.rsqrt %52 : vector<16x1xf32>
      %54 = vector.broadcast %53 : vector<16x1xf32> to vector<16x32xf32>
      %55 = arith.mulf %50, %54 : vector<16x32xf32>
      %c0_30 = arith.constant 0 : index
      %c0_31 = arith.constant 0 : index
      %56 = vector.load %arg8[%c0_30, %c0_31] : memref<1x32xf32, #tpu.memory_space<vmem>>, vector<1x32xf32>
      %57 = vector.broadcast %56 : vector<1x32xf32> to vector<16x32xf32>
      %58 = arith.mulf %55, %57 : vector<16x32xf32>
      %c0_32 = arith.constant 0 : index
      %c0_33 = arith.constant 0 : index
      %59 = vector.load %arg9[%c0_32, %c0_33] : memref<1x32xf32, #tpu.memory_space<vmem>>, vector<1x32xf32>
      %60 = vector.broadcast %59 : vector<1x32xf32> to vector<16x32xf32>
      %61 = arith.addf %58, %60 : vector<16x32xf32>
      %62 = arith.truncf %61 : vector<16x32xf32> to vector<16x32xbf16>
      %c0_34 = arith.constant 0 : index
      %c0_35 = arith.constant 0 : index
      %63 = vector.load %arg10[%c0_34, %c0_35] : memref<16x32xbf16, #tpu.memory_space<vmem>>, vector<16x32xbf16>
      tpu.vector_store %arg10[%c0_34, %c0_35], %62 {strides = array<i32>} : memref<16x32xbf16, #tpu.memory_space<vmem>>, vector<16x32xbf16>,
    } else {
    }
    return
  }
  func.func @transform_0(%arg0: i32, %arg1: i32) -> (i32, i32) {
    %c0_i32 = arith.constant 0 : i32
    %c0_i32_0 = arith.constant 0 : i32
    return %arg0, %c0_i32 : i32, i32
  }
  func.func @transform_1(%arg0: i32, %arg1: i32) -> (i32, i32) {
    %c0_i32 = arith.constant 0 : i32
    %c0_i32_0 = arith.constant 0 : i32
    return %c0_i32, %arg1 : i32, i32
  }
  func.func @transform_2(%arg0: i32, %arg1: i32) -> (i32, i32) {
    %c0_i32 = arith.constant 0 : i32
    %c0_i32_0 = arith.constant 0 : i32
    return %c0_i32, %arg1 : i32, i32
  }
  func.func @transform_3(%arg0: i32, %arg1: i32) -> (i32, i32) {
    %c0_i32 = arith.constant 0 : i32
    %c0_i32_0 = arith.constant 0 : i32
    return %arg1, %c0_i32 : i32, i32
  }
  func.func @transform_4(%arg0: i32, %arg1: i32) -> (i32, i32) {
    %c0_i32 = arith.constant 0 : i32
    %c0_i32_0 = arith.constant 0 : i32
    %c0_i32_1 = arith.constant 0 : i32
    return %c0_i32, %c0_i32_0 : i32, i32
  }
  func.func @transform_5(%arg0: i32, %arg1: i32) -> (i32, i32) {
    %c0_i32 = arith.constant 0 : i32
    %c0_i32_0 = arith.constant 0 : i32
    return %arg0, %c0_i32 : i32, i32
  }
  func.func @transform_6(%arg0: i32, %arg1: i32) -> (i32, i32) {
    %c0_i32 = arith.constant 0 : i32
    %c0_i32_0 = arith.constant 0 : i32
    %c0_i32_1 = arith.constant 0 : i32
    return %c0_i32, %c0_i32_0 : i32, i32
  }
  func.func @transform_7(%arg0: i32, %arg1: i32) -> (i32, i32) {
    %c0_i32 = arith.constant 0 : i32
    %c0_i32_0 = arith.constant 0 : i32
    %c0_i32_1 = arith.constant 0 : i32
    return %c0_i32, %c0_i32_0 : i32, i32
  }
  func.func @transform_8(%arg0: i32, %arg1: i32) -> (i32, i32) {
    %c0_i32 = arith.constant 0 : i32
    %c0_i32_0 = arith.constant 0 : i32
    return %arg0, %c0_i32 : i32, i32
  }
}

module attributes {stable_mosaic.version = 11 : i64} {
  func.func @_cls_ce_kernel(%arg0: i32, %arg1: memref<16x32xbf16, #tpu.memory_space<vmem>>, %arg2: memref<32x128xbf16, #tpu.memory_space<vmem>>, %arg3: memref<1x128xf32, #tpu.memory_space<vmem>>, %arg4: memref<16x1xi32, #tpu.memory_space<vmem>>, %arg5: memref<16x128xf32, #tpu.memory_space<vmem>>, %arg6: memref<1x1xf32, #tpu.memory_space<vmem>>, %arg7: memref<1x1xf32, #tpu.memory_space<vmem>>) attributes {dimension_semantics = [#tpu.dimension_semantics<parallel>], iteration_bounds = array<i64: 1>, scalar_prefetch = 0 : i64, scratch_operands = 0 : i64, tpu.core_type = #tpu.core_type<tc>, window_params = [{transform_indices = @transform_0, window_bounds = array<i64: 16, 32>}, {pipeline_mode = #tpu.pipeline_mode<synchronous>, transform_indices = @transform_1, window_bounds = array<i64: 32, 128>}, {pipeline_mode = #tpu.pipeline_mode<synchronous>, transform_indices = @transform_2, window_bounds = array<i64: 1, 128>}, {transform_indices = @transform_3, window_bounds = array<i64: 16, 1>}, {transform_indices = @transform_4, window_bounds = array<i64: 16, 128>}, {transform_indices = @transform_5, window_bounds = array<i64: 1, 1>}, {transform_indices = @transform_6, window_bounds = array<i64: 1, 1>}]} {
    %c0 = arith.constant 0 : index
    %c0_0 = arith.constant 0 : index
    %0 = vector.load %arg1[%c0, %c0_0] : memref<16x32xbf16, #tpu.memory_space<vmem>>, vector<16x32xbf16>
    %c0_1 = arith.constant 0 : index
    %c0_2 = arith.constant 0 : index
    %1 = vector.load %arg2[%c0_1, %c0_2] : memref<32x128xbf16, #tpu.memory_space<vmem>>, vector<32x128xbf16>
    %cst = arith.constant dense<0.000000e+00> : vector<16x128xf32>
    %2 = tpu.matmul %0, %1, %cst {dimension_numbers = #tpu.dot_dimension_numbers<[1], [0], [0], [1], [0, 0, 1, 1], [], []>} : vector<16x32xbf16>, vector<32x128xbf16>, vector<16x128xf32> -> vector<16x128xf32>
    %c0_3 = arith.constant 0 : index
    %c0_4 = arith.constant 0 : index
    %3 = vector.load %arg3[%c0_3, %c0_4] : memref<1x128xf32, #tpu.memory_space<vmem>>, vector<1x128xf32>
    %4 = vector.broadcast %3 : vector<1x128xf32> to vector<16x128xf32>
    %5 = arith.addf %2, %4 : vector<16x128xf32>
    %c0_5 = arith.constant 0 : index
    %c0_6 = arith.constant 0 : index
    %6 = vector.load %arg5[%c0_5, %c0_6] : memref<16x128xf32, #tpu.memory_space<vmem>>, vector<16x128xf32>
    tpu.vector_store %arg5[%c0_5, %c0_6], %5 {strides = array<i32>} : memref<16x128xf32, #tpu.memory_space<vmem>>, vector<16x128xf32>,
    %c0_7 = arith.constant 0 : index
    %c0_8 = arith.constant 0 : index
    %7 = vector.load %arg4[%c0_7, %c0_8] : memref<16x1xi32, #tpu.memory_space<vmem>>, vector<16x1xi32>
    %8 = tpu.iota {dimensions = array<i32: 1>} : vector<16x128xi32>
    %c7_i32 = arith.constant 7 : i32
    %9 = vector.broadcast %c7_i32 : i32 to vector<16x128xi32>
    %10 = arith.cmpi slt, %8, %9 : vector<16x128xi32>
    %cst_9 = arith.constant -1.000000e+30 : f32
    %11 = vector.broadcast %cst_9 : f32 to vector<16x128xf32>
    %12 = arith.select %10, %5, %11 : vector<16x128xi1>, vector<16x128xf32>
    %cst_10 = arith.constant dense<0xFF800000> : vector<16xf32>
    %13 = vector.multi_reduction <maximumf>, %12, %cst_10 [1] : vector<16x128xf32> to vector<16xf32>
    %14 = vector.shape_cast %13 : vector<16xf32> to vector<16x1xf32>
    %15 = vector.broadcast %14 : vector<16x1xf32> to vector<16x128xf32>
    %16 = arith.subf %12, %15 : vector<16x128xf32>
    %17 = math.exp %16 : vector<16x128xf32>
    %cst_11 = arith.constant dense<0.000000e+00> : vector<16xf32>
    %18 = vector.multi_reduction <add>, %17, %cst_11 [1] : vector<16x128xf32> to vector<16xf32>
    %19 = vector.shape_cast %18 : vector<16xf32> to vector<16x1xf32>
    %20 = math.log %19 : vector<16x1xf32>
    %21 = arith.addf %20, %14 : vector<16x1xf32>
    %22 = vector.broadcast %7 : vector<16x1xi32> to vector<16x128xi32>
    %23 = arith.cmpi eq, %8, %22 : vector<16x128xi32>
    %cst_12 = arith.constant 0.000000e+00 : f32
    %24 = vector.broadcast %cst_12 : f32 to vector<16x128xf32>
    %25 = arith.select %23, %5, %24 : vector<16x128xi1>, vector<16x128xf32>
    %cst_13 = arith.constant dense<0.000000e+00> : vector<16xf32>
    %26 = vector.multi_reduction <add>, %25, %cst_13 [1] : vector<16x128xf32> to vector<16xf32>
    %27 = vector.shape_cast %26 : vector<16xf32> to vector<16x1xf32>
    %c-100_i32 = arith.constant -100 : i32
    %28 = vector.broadcast %c-100_i32 : i32 to vector<16x1xi32>
    %29 = arith.cmpi ne, %7, %28 : vector<16x1xi32>
    %30 = arith.extui %29 : vector<16x1xi1> to vector<16x1xi32>
    %31 = arith.sitofp %30 : vector<16x1xi32> to vector<16x1xf32>
    %32 = arith.subf %21, %27 : vector<16x1xf32>
    %33 = arith.mulf %32, %31 : vector<16x1xf32>
    %34 = vector.shape_cast %33 : vector<16x1xf32> to vector<1x16x1xf32>
    %cst_14 = arith.constant dense<0.000000e+00> : vector<1xf32>
    %35 = vector.multi_reduction <add>, %34, %cst_14 [1, 2] : vector<1x16x1xf32> to vector<1xf32>
    %36 = vector.shape_cast %35 : vector<1xf32> to vector<1x1x1xf32>
    %37 = vector.extract %36[0, 0, 0] : f32 from vector<1x1x1xf32>
    %38 = vector.broadcast %37 : f32 to vector<1x1xf32>
    %c0_15 = arith.constant 0 : index
    %c0_16 = arith.constant 0 : index
    %39 = vector.load %arg6[%c0_15, %c0_16] : memref<1x1xf32, #tpu.memory_space<vmem>>, vector<1x1xf32>
    tpu.vector_store %arg6[%c0_15, %c0_16], %38 {strides = array<i32>} : memref<1x1xf32, #tpu.memory_space<vmem>>, vector<1x1xf32>,
    %40 = vector.shape_cast %31 : vector<16x1xf32> to vector<1x16x1xf32>
    %cst_17 = arith.constant dense<0.000000e+00> : vector<1xf32>
    %41 = vector.multi_reduction <add>, %40, %cst_17 [1, 2] : vector<1x16x1xf32> to vector<1xf32>
    %42 = vector.shape_cast %41 : vector<1xf32> to vector<1x1x1xf32>
    %43 = vector.extract %42[0, 0, 0] : f32 from vector<1x1x1xf32>
    %44 = vector.broadcast %43 : f32 to vector<1x1xf32>
    %c0_18 = arith.constant 0 : index
    %c0_19 = arith.constant 0 : index
    %45 = vector.load %arg7[%c0_18, %c0_19] : memref<1x1xf32, #tpu.memory_space<vmem>>, vector<1x1xf32>
    tpu.vector_store %arg7[%c0_18, %c0_19], %44 {strides = array<i32>} : memref<1x1xf32, #tpu.memory_space<vmem>>, vector<1x1xf32>,
    return
  }
  func.func @transform_0(%arg0: i32) -> (i32, i32) {
    %c0_i32 = arith.constant 0 : i32
    %c0_i32_0 = arith.constant 0 : i32
    return %arg0, %c0_i32 : i32, i32
  }
  func.func @transform_1(%arg0: i32) -> (i32, i32) {
    %c0_i32 = arith.constant 0 : i32
    %c0_i32_0 = arith.constant 0 : i32
    %c0_i32_1 = arith.constant 0 : i32
    return %c0_i32, %c0_i32_0 : i32, i32
  }
  func.func @transform_2(%arg0: i32) -> (i32, i32) {
    %c0_i32 = arith.constant 0 : i32
    %c0_i32_0 = arith.constant 0 : i32
    %c0_i32_1 = arith.constant 0 : i32
    return %c0_i32, %c0_i32_0 : i32, i32
  }
  func.func @transform_3(%arg0: i32) -> (i32, i32) {
    %c0_i32 = arith.constant 0 : i32
    %c0_i32_0 = arith.constant 0 : i32
    return %arg0, %c0_i32 : i32, i32
  }
  func.func @transform_4(%arg0: i32) -> (i32, i32) {
    %c0_i32 = arith.constant 0 : i32
    %c0_i32_0 = arith.constant 0 : i32
    return %arg0, %c0_i32 : i32, i32
  }
  func.func @transform_5(%arg0: i32) -> (i32, i32) {
    %c0_i32 = arith.constant 0 : i32
    %c0_i32_0 = arith.constant 0 : i32
    return %arg0, %c0_i32 : i32, i32
  }
  func.func @transform_6(%arg0: i32) -> (i32, i32) {
    %c0_i32 = arith.constant 0 : i32
    %c0_i32_0 = arith.constant 0 : i32
    return %arg0, %c0_i32 : i32, i32
  }
}

</mosaic_0001>

<bundles_post_ra>
// kernel: bert_forward.11
= control target key start
LH: loop header
LB: loop body
LE: loop exit
PB: predicated region body
PF: predicated region fallthrough
CT: control target
= control target key end

     0   :  { %v130_v0 = vmov 0.0   ;;  %vm131_vm0 = vmmov 0   ;;  %vm45_vm1 = vcmask 261120   ;;  %vm98_vm2 = vcmask 781312   ;;  %s170_s1 = inlined_call_operand.vmem [shape: bf16[32,96], index: 1, kind: input, shape index: {}]   ;;  %s171_s0 = inlined_call_operand.vmem [shape: bf16[16,32], index: 0, kind: input, shape index: {}]   ;;  %s172_s2 = inlined_call_operand.vmem [shape: f32[1,96], index: 2, kind: input, shape index: {}]   ;;  %s173_s3 = inlined_call_operand.vmem [shape: bf16[16,96], index: 3, kind: output, shape index: {}]  }
   0x1   :  { %117 = vmatprep.subr.bf16.mxu0 %v130_v0  ;;  %v127_v1 = vld [vmem:[%s170_s1] sm:$0xff]   ;;  %121 = vmatprep.mubr.msk.bf16.mxu0 %vm131_vm0, %v130_v0  ;;  %v128_v2 = vld [vmem:[%s170_s1 + $0x8] sm:$0xff]  }
   0x2   :  { %118 = vmatpush3.bf16.msra.mxu0 %v127_v1  ;;  %v129_v3 = vld [vmem:[%s171_s0] sm:$0xff]  }
   0x3   :  { %119 = vmatprep.subr.bf16.mxu0 %v130_v0  ;;  %v105_v4 = vld [vmem:[%s172_s2] ss:$0 sm:$0xff] }
   0x6   :  { %120 = vmatpush3.bf16.msra.mxu0 %v128_v2 }
   0x9   :  { %122 = vmatmul.mubr.msk.bf16.vlgmr.msra.gmra.mrb[0].mxu0 %vm45_vm1, %v129_v3 }
  0xdc   :  { %v83_v5 = vpop.f32.mrb[0].mxu0 }
  0xdd   :  { %v84_v6 = vadd.f32 %v105_v4, %v83_v5  ;;  %v123_v7 = vpop.f32.mrb[1].mxu0 }
  0xde   :  { %v86_v8 = vpop.f32.mrb[2].mxu0 }
  0xdf   :  { %v112_v9 = vpack.c.bf16 %v84_v6, %v84_v6  ;;  %v87_v10 = vadd.f32 %v105_v4, %v86_v8  ;;  %v124_v11 = vpop.f32.mrb[3].mxu0 }
  0xe1   :  { %99 = vst.msk [vmem:[%s173_s3] sm:$0xf] %vm98_vm2, %v112_v9  ;;  %v113_v12 = vpack.c.bf16 %v87_v10, %v87_v10 }
  0xe3   :  { %100 = vst.msk [vmem:[%s173_s3 + $0x4] sm:$0xf] %vm98_vm2, %v113_v12 }

// kernel: bert_forward.10
= control target key start
LH: loop header
LB: loop body
LE: loop exit
PB: predicated region body
PF: predicated region fallthrough
CT: control target
= control target key end

     0   :  { %s338_s15 = smov 0   ;;  %s364_s0 = inlined_call_operand.vmem [shape: bf16[16,32], index: 0, kind: input, shape index: {}]   ;;  %s365_s1 = inlined_call_operand.vmem [shape: f32[8,32], index: 1, kind: input, shape index: {}]   ;;  %s366_s2 = inlined_call_operand.vmem [shape: f32[1,32], index: 2, kind: input, shape index: {}]   ;;  %s367_s3 = inlined_call_operand.vmem [shape: f32[1,32], index: 3, kind: input, shape index: {}]   ;;  %s368_s4 = inlined_call_operand.vmem [shape: bf16[16,32], index: 4, kind: output, shape index: {}]  }
   0x1 LB: > { %s284_s16 = sadd.s32 4294967295, %s311_s15   ;;  %p288_p0 = scmp.ge.s32.totalorder %s311_s15, 1  ;;  %s311_s15 = sphi %s338_s15, %s14_s15  }
   0x2   : > { %p161_p1 = scmp.lt.s32.totalorder %s311_s15, 3 }
   0x4   : > { %p162_p2 = pnand %p288_p0, %p161_p1 }
   0x5   : > { %p185_p3 = scmp.lt.s32.totalorder (!%p162_p2), %s284_s16, 1  ;;  %v195_v1 = vld [vmem:[%s365_s1] sm:$0xff] (!%p162_p2)  ;;  %vm197_vm0 = vcmask (!%p162_p2), 261120   ;;  %vm229_vm1 = vcmask (!%p162_p2), 257024  }
   0x6   : > { %165 = sbr.rel (%p162_p2) target bundleno = 337 (0x151), region = 36  ;;  %v291_v14 = vld [vmem:[%s366_s2] ss:$0 sm:$0xff] (!%p162_p2) }
   0x7   : > { %v292_v16 = vld [vmem:[%s367_s3] ss:$0 sm:$0xff] (!%p162_p2) }
   0xd   : > { %s370_s16 = smov (!%p185_p3, %s284_s16), 1 }
   0xe   : > { %s289_s17 = sshll.u32 %s370_s16, 2 }
   0xf   : > { %s188_s20 = scalar_lea.vmem %s364_s0, %s289_s17  ;;  %s192_s29 = scalar_lea.vmem %s368_s4, %s289_s17 }
  0x10   : > { %v193_v0 = vld [vmem:[%s188_s20] sm:$0xf] }
  0x11   : > { %v194_v2 = vunpack.c.l.bf16 %v193_v0 }
  0x13   : > { %v196_v3 = vadd.f32 %v195_v1, %v194_v2 }
  0x15   : > { %v198_v4 = vsel %vm197_vm0, %v196_v3, 0.0 }
  0x16   : > { %199 = vadd.xlane.f32.xlu0 %v198_v4 }
  0xa3   : > { %v200_v5 = vpop.xlane.xlu0 %199 }
  0xa4   : > { %v202_v6 = vmul.f32 0.03125, %v200_v5 }
  0xa6   : > { %v203_v7 = vsub.f32 %v196_v3, %v202_v6 }
  0xa8   : > { %v204_v8 = vmul.f32 %v203_v7, %v203_v7 }
  0xaa   : > { %v205_v9 = vsel %vm197_vm0, %v204_v8, 0.0 }
  0xab   : > { %206 = vadd.xlane.f32.xlu0 %v205_v9 }
 0x138   : > { %v207_v10 = vpop.xlane.xlu0 %206 }
 0x139   : > { %v208_v11 = vmul.f32 0.03125, %v207_v10 }
 0x13b   : > { %v209_v12 = vadd.f32 1e-12, %v208_v11 }
 0x13d   : > { %303 = vrsqrt.f32 %v209_v12 }
 0x147   : > { %v304_v13 = vpop.eup %303 }
 0x148   : > { %v211_v15 = vmul.f32 %v304_v13, %v203_v7 }
 0x14a   : > { %v219_v17 = vmul.f32 %v291_v14, %v211_v15 }
 0x14c   : > { %v227_v18 = vadd.f32 %v292_v16, %v219_v17 }
 0x14e   : > { %v228_v19 = vpack.c.bf16 %v227_v18, %v227_v18 }
 0x150   : > { %230 = vst.msk [vmem:[%s192_s29] sm:$0xf] %vm229_vm1, %v228_v19 }
 0x151 PF: > { %s14_s15 = sadd.s32 1, %s311_s15  }
 0x152   : > { %p11_p4 = scmp.ge.s32.totalorder %s14_s15, 4  }
 0x154   :  { %13 = sbr.rel (!%p11_p4) target bundleno = 1 (0x1), region = 66 }

// kernel: bert_forward.13
= control target key start
LH: loop header
LB: loop body
LE: loop exit
PB: predicated region body
PF: predicated region fallthrough
CT: control target
= control target key end

     0   :  { %v200_v0 = vmov 0.0   ;;  %vm201_vm0 = vmmov 0   ;;  %vm54_vm1 = vcmask 261120   ;;  %vm158_vm2 = vcmask 257024   ;;  %s269_s1 = inlined_call_operand.vmem [shape: bf16[32,32], index: 1, kind: input, shape index: {}]   ;;  %s270_s0 = inlined_call_operand.vmem [shape: bf16[16,32], index: 0, kind: input, shape index: {}]   ;;  %s271_s3 = inlined_call_operand.vmem [shape: bf16[16,32], index: 3, kind: input, shape index: {}]   ;;  %s272_s2 = inlined_call_operand.vmem [shape: f32[1,32], index: 2, kind: input, shape index: {}]   ;;  %s273_s4 = inlined_call_operand.vmem [shape: f32[1,32], index: 4, kind: input, shape index: {}]   ;;  %s274_s5 = inlined_call_operand.vmem [shape: f32[1,32], index: 5, kind: input, shape index: {}]   ;;  %s275_s6 = inlined_call_operand.vmem [shape: bf16[16,32], index: 6, kind: output, shape index: {}]  }
   0x1   :  { %183 = vmatprep.subr.bf16.mxu0 %v200_v0  ;;  %v193_v1 = vld [vmem:[%s269_s1] sm:$0xff]   ;;  %187 = vmatprep.mubr.msk.bf16.mxu0 %vm201_vm0, %v200_v0  ;;  %v194_v2 = vld [vmem:[%s269_s1 + $0x8] sm:$0xff]  }
   0x2   :  { %184 = vmatpush3.bf16.msra.mxu0 %v193_v1  ;;  %v195_v3 = vld [vmem:[%s270_s0] sm:$0xff]  }
   0x3   :  { %185 = vmatprep.subr.bf16.mxu0 %v200_v0  ;;  %v177_v4 = vld [vmem:[%s271_s3] sm:$0xff]  }
   0x4   :  { %v165_v5 = vld [vmem:[%s272_s2] ss:$0 sm:$0xff]  ;;  %v178_v6 = vunpack.c.l.bf16 %v177_v4  ;;  %v179_v10 = vunpack.c.h.bf16 %v177_v4 }
   0x5   :  { %v170_v35 = vld [vmem:[%s273_s4] ss:$0 sm:$0xff] }
   0x6   :  { %186 = vmatpush3.bf16.msra.mxu0 %v194_v2  ;;  %v171_v37 = vld [vmem:[%s274_s5] ss:$0 sm:$0xff] }
   0x9   :  { %188 = vmatmul.mubr.msk.bf16.vlgmr.msra.gmra.mrb[0].mxu0 %vm54_vm1, %v195_v3 }
  0xdc   :  { %v92_v7 = vpop.f32.mrb[0].mxu0 }
  0xdd   :  { %v93_v8 = vadd.f32 %v165_v5, %v92_v7  ;;  %v189_v9 = vpop.f32.mrb[1].mxu0 }
  0xde   :  { %v95_v11 = vpop.f32.mrb[2].mxu0 }
  0xdf   :  { %v96_v12 = vadd.f32 %v165_v5, %v95_v11  ;;  %v190_v13 = vpop.f32.mrb[3].mxu0  ;;  %v103_v14 = vadd.f32 %v178_v6, %v93_v8 }
  0xe1   :  { %v105_v15 = vsel %vm54_vm1, %v103_v14, 0.0  ;;  %v104_v16 = vadd.f32 %v179_v10, %v96_v12 }
  0xe2   :  { %106 = vadd.xlane.f32.xlu0 %v105_v15 }
  0xe3   :  { %v108_v17 = vsel %vm54_vm1, %v104_v16, 0.0 }
  0xe6   :  { %109 = vadd.xlane.f32.xlu0 %v108_v17 }
 0x16f   :  { %v107_v18 = vpop.xlane.xlu0 %106 }
 0x170   :  { %v112_v19 = vmul.f32 0.03125, %v107_v18 }
 0x172   :  { %v114_v20 = vsub.f32 %v103_v14, %v112_v19 }
 0x173   :  { %v110_v21 = vpop.xlane.xlu0 %109 }
 0x174   :  { %v113_v22 = vmul.f32 0.03125, %v110_v21  ;;  %v116_v23 = vmul.f32 %v114_v20, %v114_v20 }
 0x176   :  { %v115_v24 = vsub.f32 %v104_v16, %v113_v22  ;;  %v118_v25 = vsel %vm54_vm1, %v116_v23, 0.0 }
 0x177   :  { %119 = vadd.xlane.f32.xlu1 %v118_v25 }
 0x178   :  { %v117_v26 = vmul.f32 %v115_v24, %v115_v24 }
 0x17a   :  { %v121_v27 = vsel %vm54_vm1, %v117_v26, 0.0 }
 0x17b   :  { %122 = vadd.xlane.f32.xlu1 %v121_v27 }
 0x204   :  { %v120_v28 = vpop.xlane.xlu1 %119 }
 0x205   :  { %v124_v29 = vmul.f32 0.03125, %v120_v28 }
 0x207   :  { %v126_v30 = vadd.f32 1e-12, %v124_v29 }
 0x208   :  { %v123_v31 = vpop.xlane.xlu1 %122 }
 0x209   :  { %196 = vrsqrt.f32 %v126_v30  ;;  %v125_v32 = vmul.f32 0.03125, %v123_v31 }
 0x20b   :  { %v127_v33 = vadd.f32 1e-12, %v125_v32 }
 0x20d   :  { %198 = vrsqrt.f32 %v127_v33 }
 0x213   :  { %v197_v34 = vpop.eup %196 }
 0x214   :  { %v130_v36 = vmul.f32 %v197_v34, %v114_v20 }
 0x216   :  { %v139_v38 = vmul.f32 %v170_v35, %v130_v36 }
 0x217   :  { %v199_v39 = vpop.eup %198 }
 0x218   :  { %v148_v40 = vadd.f32 %v171_v37, %v139_v38  ;;  %v131_v41 = vmul.f32 %v199_v39, %v115_v24 }
 0x21a   :  { %v174_v42 = vpack.c.bf16 %v148_v40, %v148_v40  ;;  %v140_v43 = vmul.f32 %v170_v35, %v131_v41 }
 0x21c   :  { %159 = vst.msk [vmem:[%s275_s6] sm:$0xf] %vm158_vm2, %v174_v42  ;;  %v149_v44 = vadd.f32 %v171_v37, %v140_v43 }
 0x21e   :  { %v175_v45 = vpack.c.bf16 %v149_v44, %v149_v44 }
 0x220   :  { %160 = vst.msk [vmem:[%s275_s6 + $0x4] sm:$0xf] %vm158_vm2, %v175_v45 }

// kernel: bert_forward.12
= control target key start
LH: loop header
LB: loop body
LE: loop exit
PB: predicated region body
PF: predicated region fallthrough
CT: control target
= control target key end

     0   :  { %s563_s9 = smov 0   ;;  %s608_s0 = inlined_call_operand.vmem [shape: bf16[16,96], index: 0, kind: input, shape index: {}]   ;;  %s609_s1 = inlined_call_operand.vmem [shape: f32[2,1,8], index: 1, kind: input, shape index: {}]   ;;  %s610_s2 = inlined_call_operand.vmem [shape: bf16[16,32], index: 2, kind: output, shape index: {}]  }
   0x1 LB: > { %s460_s10 = sadd.s32 4294967295, %s538_s9   ;;  %p464_p0 = scmp.ge.s32.totalorder %s538_s9, 1  ;;  %s538_s9 = sphi %s563_s9, %s12_s9  }
   0x2   : > { %p119_p1 = scmp.lt.s32.totalorder %s538_s9, 3 }
   0x4   : > { %p120_p2 = pnand %p464_p0, %p119_p1 }
   0x5   : > { %p142_p3 = scmp.lt.s32.totalorder (!%p120_p2), %s460_s10, 1  ;;  %v540_v0 = vmov (!%p120_p2), 0.0   ;;  %vm541_vm0 = vmmov (!%p120_p2), 0   ;;  %s542_s15 = smov (!%p120_p2), 96   ;;  %vm170_vm1 = vcmask (!%p120_p2), 130048   ;;  %vm217_vm2 = vcmask (!%p120_p2), 64512  }
   0x6   : > { %123 = sbr.rel (%p120_p2) target bundleno = 1231 (0x4cf), region = 28  ;;  %483 = vmatprep.subr.bf16.mxu0 (!%p120_p2), %v540_v0  ;;  %485 = vmatprep.mubr.msk.bf16.mxu0 (!%p120_p2), %vm541_vm0, %v540_v0  ;;  %s543_s16 = smov (!%p120_p2), 64   ;;  %vm233_vm3 = vcmask (!%p120_p2), 1043456   ;;  %vm396_vm4 = vcmask (!%p120_p2), 257024  }
   0x7   : > { %489 = vmatprep.subr.bf16.mxu1 (!%p120_p2), %v540_v0  ;;  %491 = vmatprep.mubr.msk.bf16.mxu1 (!%p120_p2), %vm541_vm0, %v540_v0  ;;  %s544_s17 = smov (!%p120_p2), 80   ;;  %s545_s18 = smov (!%p120_p2), 112  }
   0x8   : > { %s546_s22 = smov (!%p120_p2), 48   ;;  %s547_s23 = smov (!%p120_p2), 16  }
   0xd   : > { %s612_s10 = smov (!%p142_p3, %s460_s10), 1 }
   0xe   : > { %s465_s11 = sshll.u32 %s612_s10, 2  ;;  %s148_s21 = scalar_lea.vmem %s609_s1, %s612_s10 }
   0xf   : > { %s145_s14 = scalar_lea.vmem %s608_s0, %s465_s11  ;;  %v467_v8 = vld [vmem:[%s148_s21] ss:$0 sm:$0xff]  ;;  %s152_s26 = scalar_lea.vmem %s610_s2, %s465_s11 }
  0x10   : > { %v155_v1 = vld [vmem:[%s145_s14] sm:$0xf] }
  0x11   : > { %v468_v2 = vcombine.low %v155_v1, %v155_v1  ;;  %v156_v3 = vunpack.c.l.bf16 %v155_v1 }
  0x13   : > { %168 = vrot.lane.b32.xlu0 %v468_v2, %s542_s15  ;;  %v157_v6 = vmul.f32 0.25, %v156_v3  ;;  %228 = vrot.lane.b32.xlu1 %v468_v2, %s543_s16 }
  0x15   : > { %v158_v7 = vpack.c.bf16 %v157_v6, %v157_v6 }
  0x17   : > { %282 = vrot.lane.b32.xlu1 %v468_v2, %s544_s17 }
  0x1b   : > { %280 = vrot.lane.b32.xlu1 %v158_v7, %s545_s18 }
  0x85   : > { %v169_v4 = vpop.permute.xlu0 %168  ;;  %v229_v15 = vpop.permute.xlu1 %228 }
  0x86   : > { %v175_v5 = vsel %vm170_vm1, %v169_v4, 0  ;;  %v235_v16 = vsel %vm233_vm3, %v229_v15, 0 }
  0x87   : > { %484 = vmatpush3.bf16.xpose.msra.mxu0 %v175_v5  ;;  %490 = vmatpush3.bf16.msra.mxu1 %v235_v16 }
  0x88   : > { %501 = vmatprep.subr.bf16.mxu0 %v540_v0  ;;  %495 = vmatprep.subr.bf16.mxu1 %v540_v0 }
  0x89   : > { %v283_v20 = vpop.permute.xlu1 %282 }
  0x8a   : > { %v288_v22 = vsel %vm170_vm1, %v283_v20, 0 }
  0x8d   : > { %v281_v24 = vpop.permute.xlu1 %280 }
  0x8e   : > { %486 = vmatmul.mubr.msk.bf16.vlgmr.msra.gmra.mrb[0].mxu0 %vm170_vm1, %v158_v7 }
  0x8f   : > { %503 = vmatprep.mubr.msk.bf16.mxu0 %vm541_vm0, %v540_v0 }
 0x161   : > { %v211_v9 = vpop.f32.mrb[0].mxu0 }
 0x162   : > { %v212_v10 = vadd.f32 %v467_v8, %v211_v9  ;;  %v487_v11 = vpop.f32.mrb[1].mxu0 }
 0x163   : > { %v214_v12 = vpop.f32.mrb[2].mxu0 }
 0x164   : > { %v488_v13 = vpop.f32.mrb[3].mxu0  ;;  %v218_v14 = vsel %vm217_vm2, %v212_v10, -inf }
 0x165   : > { %219 = vmax.xlane.f32.xlu0 %v218_v14 }
 0x17b   : > { %340 = vrot.lane.b32.xlu0 %v468_v2, %s546_s22 }
 0x1f2   : > { %v220_v17 = vpop.xlane.xlu0 %219 }
 0x1f3   : > { %v221_v18 = vsub.f32 %v212_v10, %v220_v17 }
 0x1f5   : > { %v222_v19 = vmul.f32 1.442695, %v221_v18 }
 0x1f6   : > { %v341_v35 = vpop.permute.xlu0 %340 }
 0x1f7   : > { %524 = vpow2.f32 %v222_v19  ;;  %v346_v36 = vsel %vm233_vm3, %v341_v35, 0 }
 0x1f8   : > { %502 = vmatpush3.bf16.msra.mxu0 %v346_v36 }
 0x201   : > { %v525_v21 = vpop.eup %524 }
 0x202   : > { %v227_v23 = vpack.c.bf16 %v525_v21, %v525_v21  ;;  %v224_v43 = vsel %vm217_vm2, %v525_v21, 0.0 }
 0x204   : > { %492 = vmatmul.mubr.msk.bf16.vlgmr.msra.gmra.mrb[0].mxu1 %vm217_vm2, %v227_v23 }
 0x205   : > { %496 = vmatpush3.bf16.xpose.msra.mxu1 %v288_v22  ;;  %497 = vmatprep.mubr.msk.bf16.mxu1 %vm541_vm0, %v540_v0 }
 0x20c   : > { %498 = vmatmul.mubr.msk.bf16.vlgmr.msra.gmra.mrb[4].mxu1 %vm170_vm1, %v281_v24 }
 0x2d7   : > { %v271_v25 = vpop.f32.mrb[0].mxu1 }
 0x2d8   : > { %v493_v26 = vpop.f32.mrb[1].mxu1 }
 0x2d9   : > { %v274_v27 = vpop.f32.mrb[2].mxu1 }
 0x2da   : > { %v494_v28 = vpop.f32.mrb[3].mxu1 }
 0x2df   : > { %v324_v29 = vpop.f32.mrb[4].mxu1 }
 0x2e0   : > { %v325_v30 = vadd.f32 %v467_v8, %v324_v29  ;;  %v499_v31 = vpop.f32.mrb[5].mxu1 }
 0x2e1   : > { %v327_v32 = vpop.f32.mrb[6].mxu1 }
 0x2e2   : > { %v500_v33 = vpop.f32.mrb[7].mxu1  ;;  %v330_v34 = vsel %vm217_vm2, %v325_v30, -inf }
 0x2e3   : > { %331 = vmax.xlane.f32.xlu1 %v330_v34 }
 0x370   : > { %v332_v37 = vpop.xlane.xlu1 %331 }
 0x371   : > { %v333_v38 = vsub.f32 %v325_v30, %v332_v37 }
 0x373   : > { %v334_v39 = vmul.f32 1.442695, %v333_v38 }
 0x375   : > { %526 = vpow2.f32 %v334_v39 }
 0x37f   : > { %v527_v40 = vpop.eup %526 }
 0x380   : > { %v336_v41 = vsel %vm217_vm2, %v527_v40, 0.0  ;;  %v339_v42 = vpack.c.bf16 %v527_v40, %v527_v40 }
 0x381   : > { %337 = vadd.xlane.f32.xlu1 %v336_v41 }
 0x382   : > { %504 = vmatmul.mubr.msk.bf16.vlgmr.msra.gmra.mrb[4].mxu0 %vm217_vm2, %v339_v42 }
 0x385   : > { %225 = vadd.xlane.f32.xlu1 %v224_v43 }
 0x40e   : > { %v338_v44 = vpop.xlane.xlu1 %337 }
 0x40f   : > { %528 = vrcp.f32 %v338_v44 }
 0x412   : > { %v226_v51 = vpop.xlane.xlu1 %225 }
 0x413   : > { %530 = vrcp.f32 %v226_v51 }
 0x419   : > { %v529_v45 = vpop.eup %528 }
 0x41d   : > { %v531_v52 = vpop.eup %530 }
 0x41e   : > { %v278_v53 = vmul.f32 %v531_v52, %v271_v25 }
 0x455   : > { %v382_v46 = vpop.f32.mrb[4].mxu0 }
 0x456   : > { %v389_v47 = vmul.f32 %v529_v45, %v382_v46  ;;  %v505_v48 = vpop.f32.mrb[5].mxu0 }
 0x457   : > { %v385_v49 = vpop.f32.mrb[6].mxu0 }
 0x458   : > { %391 = vrot.lane.b32.xlu1 %v389_v47, %s547_s23  ;;  %v506_v50 = vpop.f32.mrb[7].mxu0 }
 0x4ca   : > { %v392_v54 = vpop.permute.xlu1 %391 }
 0x4cb   : > { %v394_v55 = vsel %vm170_vm1, %v278_v53, %v392_v54 }
 0x4cc   : > { %v395_v56 = vpack.c.bf16 %v394_v55, %v394_v55 }
 0x4ce   : > { %397 = vst.msk [vmem:[%s152_s26] sm:$0xf] %vm396_vm4, %v395_v56 }
 0x4cf PF: > { %s12_s9 = sadd.s32 1, %s538_s9  }
 0x4d0   : > { %p9_p4 = scmp.ge.s32.totalorder %s12_s9, 4  }
 0x4d2   :  { %11 = sbr.rel (!%p9_p4) target bundleno = 1 (0x1), region = 61 }

// kernel: bert_forward.14
= control target key start
LH: loop header
LB: loop body
LE: loop exit
PB: predicated region body
PF: predicated region fallthrough
CT: control target
= control target key end

     0   :  { %vm34_vm0 = vcmask 261120   ;;  %v407_v0 = vmov 0.0   ;;  %vm408_vm1 = vmmov 0   ;;  %vm315_vm2 = vcmask 257024   ;;  %s517_s1 = inlined_call_operand.vmem [shape: bf16[32,128], index: 1, kind: input, shape index: {}]   ;;  %s518_s0 = inlined_call_operand.vmem [shape: bf16[16,32], index: 0, kind: input, shape index: {}, may-alias: {0,5}]   ;;  %s519_s3 = inlined_call_operand.vmem [shape: bf16[128,32], index: 3, kind: input, shape index: {}]   ;;  %s520_s2 = inlined_call_operand.vmem [shape: f32[1,128], index: 2, kind: input, shape index: {}]   ;;  %s521_s5 = inlined_call_operand.vmem [shape: bf16[16,32], index: 5, kind: input, shape index: {}, may-alias: {0,5}]   ;;  %s522_s4 = inlined_call_operand.vmem [shape: f32[1,32], index: 4, kind: input, shape index: {}]   ;;  %s523_s6 = inlined_call_operand.vmem [shape: f32[1,32], index: 6, kind: input, shape index: {}]   ;;  %s524_s7 = inlined_call_operand.vmem [shape: f32[1,32], index: 7, kind: input, shape index: {}]   ;;  %s525_s8 = inlined_call_operand.vmem [shape: bf16[16,32], index: 8, kind: output, shape index: {}]  }
   0x1   :  { %358 = vmatprep.subr.bf16.mxu0 %v407_v0  ;;  %v388_v1 = vld [vmem:[%s517_s1] sm:$0xff]   ;;  %362 = vmatprep.mubr.msk.bf16.mxu0 %vm408_vm1, %v407_v0  ;;  %35 = vst.msk [vmem:[#allocation2] sm:$0xff] %vm34_vm0, %v407_v0  ;;  %36 = vst.msk [vmem:[#allocation2 + $0x8] sm:$0xff] %vm34_vm0, %v407_v0  ;;  %v389_v2 = vld [vmem:[%s517_s1 + $0x8] sm:$0xff]  }
   0x2   :  { %366 = vmatprep.subr.bf16.mxu1 %v407_v0  ;;  %382 = vmatprep.mubr.msk.bf16.mxu1 %vm408_vm1, %v407_v0  ;;  %v390_v3 = vld [vmem:[%s518_s0] sm:$0xff]   ;;  %v392_v5 = vld [vmem:[%s519_s3 + $0x8] sm:$0xff]   ;;  %v393_v6 = vld [vmem:[%s519_s3 + $0x10] sm:$0xff]  }
   0x3   :  { %359 = vmatpush3.bf16.msra.mxu0 %v388_v1  ;;  %v391_v4 = vld [vmem:[%s519_s3] sm:$0xff]   ;;  %v394_v7 = vld [vmem:[%s519_s3 + $0x18] sm:$0xff]   ;;  %v396_v9 = vld [vmem:[%s519_s3 + $0x28] sm:$0xff]  }
   0x4   :  { %360 = vmatprep.subr.bf16.mxu0 %v407_v0  ;;  %367 = vmatpush3.bf16.msra.mxu1 %v391_v4  ;;  %v395_v8 = vld [vmem:[%s519_s3 + $0x20] sm:$0xff]   ;;  %v397_v10 = vld [vmem:[%s519_s3 + $0x30] sm:$0xff]   ;;  %v398_v11 = vld [vmem:[%s519_s3 + $0x38] sm:$0xff]  }
   0x5   :  { %368 = vmatprep.subr.bf16.mxu1 %v407_v0  ;;  %v322_v12 = vld [vmem:[%s520_s2] ss:$0 sm:$0xff] }
   0x6   :  { %v343_v46 = vld [vmem:[%s521_s5] sm:$0xff]  }
   0x7   :  { %361 = vmatpush3.bf16.msra.mxu0 %v389_v2  ;;  %v335_v47 = vld [vmem:[%s522_s4] ss:$0 sm:$0xff]  ;;  %v344_v48 = vunpack.c.l.bf16 %v343_v46  ;;  %v345_v51 = vunpack.c.h.bf16 %v343_v46 }
   0x8   :  { %369 = vmatpush3.bf16.msra.mxu1 %v392_v5  ;;  %v130_v38 = vld [vmem:[#allocation2] sm:$0xff]  ;;  %v131_v40 = vld [vmem:[#allocation2 + $0x8] sm:$0xff] }
   0x9   :  { %370 = vmatprep.subr.bf16.mxu1 %v407_v0 }
   0xa   :  { %363 = vmatmul.mubr.msk.bf16.vlgmr.msra.gmra.mrb[0].mxu0 %vm34_vm0, %v390_v3 }
   0xc   :  { %371 = vmatpush3.bf16.msra.mxu1 %v393_v6 }
   0xd   :  { %372 = vmatprep.subr.bf16.mxu1 %v407_v0 }
  0x10   :  { %373 = vmatpush3.bf16.msra.mxu1 %v394_v7 }
  0x11   :  { %374 = vmatprep.subr.bf16.mxu1 %v407_v0 }
  0x14   :  { %375 = vmatpush3.bf16.msra.mxu1 %v395_v8 }
  0x15   :  { %376 = vmatprep.subr.bf16.mxu1 %v407_v0 }
  0x18   :  { %377 = vmatpush3.bf16.msra.mxu1 %v396_v9 }
  0x19   :  { %378 = vmatprep.subr.bf16.mxu1 %v407_v0 }
  0x1c   :  { %379 = vmatpush3.bf16.msra.mxu1 %v397_v10 }
  0x1d   :  { %380 = vmatprep.subr.bf16.mxu1 %v407_v0 }
  0x20   :  { %381 = vmatpush3.bf16.msra.mxu1 %v398_v11  ;;  %v336_v11 = vld [vmem:[%s523_s6] ss:$0 sm:$0xff] }
  0xdd   :  { %v105_v13 = vpop.f32.mrb[0].mxu0 }
  0xde   :  { %v106_v14 = vadd.f32 %v322_v12, %v105_v13  ;;  %v364_v15 = vpop.f32.mrb[1].mxu0  ;;  %v337_v13 = vld [vmem:[%s524_s7] ss:$0 sm:$0xff] }
  0xdf   :  { %v108_v16 = vpop.f32.mrb[2].mxu0 }
  0xe0   :  { %v112_v17 = vmul.f32 %v106_v14, %v106_v14  ;;  %v109_v18 = vadd.f32 %v322_v12, %v108_v16  ;;  %v365_v19 = vpop.f32.mrb[3].mxu0 }
  0xe2   :  { %v114_v20 = vmul.f32 %v112_v17, %v106_v14  ;;  %v113_v21 = vmul.f32 %v109_v18, %v109_v18 }
  0xe4   :  { %v116_v22 = vmul.f32 0.044715, %v114_v20  ;;  %v115_v23 = vmul.f32 %v113_v21, %v109_v18 }
  0xe6   :  { %v118_v24 = vadd.f32 %v116_v22, %v106_v14  ;;  %v117_v25 = vmul.f32 0.044715, %v115_v23 }
  0xe8   :  { %v120_v26 = vmul.f32 0.7978846, %v118_v24  ;;  %v119_v27 = vadd.f32 %v117_v25, %v109_v18 }
  0xea   :  { %399 = vtanh.f32 %v120_v26  ;;  %v121_v28 = vmul.f32 0.7978846, %v119_v27 }
  0xec   :  { %401 = vtanh.f32 %v121_v28 }
  0xf4   :  { %v400_v29 = vpop.eup %399 }
  0xf5   :  { %v124_v30 = vadd.f32 1.0, %v400_v29 }
  0xf6   :  { %v402_v31 = vpop.eup %401 }
  0xf7   :  { %v125_v32 = vadd.f32 1.0, %v402_v31  ;;  %v126_v33 = vmul.f32 0.5, %v124_v30 }
  0xf9   :  { %v127_v34 = vmul.f32 0.5, %v125_v32  ;;  %v128_v35 = vmul.f32 %v126_v33, %v106_v14 }
  0xfb   :  { %v129_v36 = vmul.f32 %v127_v34, %v109_v18 }
  0xfd   :  { %v132_v37 = vpack.c.bf16 %v129_v36, %v128_v35 }
  0xff   :  { %383 = vmatmul.mubr.bf16.vlgmr.msra.gmra.mrb[0].mxu1 %v132_v37 }
 0x1d2   :  { %v231_v39 = vpop.f32.mrb[0].mxu1 }
 0x1d3   :  { %v238_v41 = vadd.f32 %v231_v39, %v130_v38  ;;  %v384_v42 = vpop.f32.mrb[1].mxu1 }
 0x1d4   :  { %v234_v43 = vpop.f32.mrb[2].mxu1 }
 0x1d5   :  { %240 = vst.msk [vmem:[#allocation2] sm:$0xff] %vm34_vm0, %v238_v41  ;;  %v239_v44 = vadd.f32 %v234_v43, %v131_v40  ;;  %v385_v45 = vpop.f32.mrb[3].mxu1 }
 0x1d7   :  { %241 = vst.msk [vmem:[#allocation2 + $0x8] sm:$0xff] %vm34_vm0, %v239_v44 }
 0x1dc   :  { %v245_v49 = vld [vmem:[#allocation2] sm:$0xff] }
 0x1dd   :  { %v254_v50 = vadd.f32 %v335_v47, %v245_v49 }
 0x1de   :  { %v246_v52 = vld [vmem:[#allocation2 + $0x8] sm:$0xff] }
 0x1df   :  { %v260_v53 = vadd.f32 %v344_v48, %v254_v50  ;;  %v255_v54 = vadd.f32 %v335_v47, %v246_v52 }
 0x1e1   :  { %v262_v55 = vsel %vm34_vm0, %v260_v53, 0.0  ;;  %v261_v56 = vadd.f32 %v345_v51, %v255_v54 }
 0x1e2   :  { %263 = vadd.xlane.f32.xlu0 %v262_v55 }
 0x1e3   :  { %v265_v57 = vsel %vm34_vm0, %v261_v56, 0.0 }
 0x1e6   :  { %266 = vadd.xlane.f32.xlu0 %v265_v57 }
 0x26f   :  { %v264_v58 = vpop.xlane.xlu0 %263 }
 0x270   :  { %v269_v59 = vmul.f32 0.03125, %v264_v58 }
 0x272   :  { %v271_v60 = vsub.f32 %v260_v53, %v269_v59 }
 0x273   :  { %v267_v61 = vpop.xlane.xlu0 %266 }
 0x274   :  { %v270_v62 = vmul.f32 0.03125, %v267_v61  ;;  %v273_v63 = vmul.f32 %v271_v60, %v271_v60 }
 0x276   :  { %v272_v0 = vsub.f32 %v261_v56, %v270_v62  ;;  %v275_v1 = vsel %vm34_vm0, %v273_v63, 0.0 }
 0x277   :  { %276 = vadd.xlane.f32.xlu1 %v275_v1 }
 0x278   :  { %v274_v2 = vmul.f32 %v272_v0, %v272_v0 }
 0x27a   :  { %v278_v3 = vsel %vm34_vm0, %v274_v2, 0.0 }
 0x27b   :  { %279 = vadd.xlane.f32.xlu1 %v278_v3 }
 0x304   :  { %v277_v4 = vpop.xlane.xlu1 %276 }
 0x305   :  { %v281_v5 = vmul.f32 0.03125, %v277_v4 }
 0x307   :  { %v283_v6 = vadd.f32 1e-12, %v281_v5 }
 0x308   :  { %v280_v7 = vpop.xlane.xlu1 %279 }
 0x309   :  { %403 = vrsqrt.f32 %v283_v6  ;;  %v282_v8 = vmul.f32 0.03125, %v280_v7 }
 0x30b   :  { %v284_v9 = vadd.f32 1e-12, %v282_v8 }
 0x30d   :  { %405 = vrsqrt.f32 %v284_v9 }
 0x313   :  { %v404_v10 = vpop.eup %403 }
 0x314   :  { %v287_v12 = vmul.f32 %v404_v10, %v271_v60 }
 0x316   :  { %v296_v14 = vmul.f32 %v336_v11, %v287_v12 }
 0x317   :  { %v406_v15 = vpop.eup %405 }
 0x318   :  { %v305_v16 = vadd.f32 %v337_v13, %v296_v14  ;;  %v288_v17 = vmul.f32 %v406_v15, %v272_v0 }
 0x31a   :  { %v340_v18 = vpack.c.bf16 %v305_v16, %v305_v16  ;;  %v297_v19 = vmul.f32 %v336_v11, %v288_v17 }
 0x31c   :  { %316 = vst.msk [vmem:[%s525_s8] sm:$0xf] %vm315_vm2, %v340_v18  ;;  %v306_v20 = vadd.f32 %v337_v13, %v297_v19 }
 0x31e   :  { %v341_v21 = vpack.c.bf16 %v306_v20, %v306_v20 }
 0x320   :  { %317 = vst.msk [vmem:[%s525_s8 + $0x4] sm:$0xf] %vm315_vm2, %v341_v21 }

// kernel: bert_forward.19
= control target key start
LH: loop header
LB: loop body
LE: loop exit
PB: predicated region body
PF: predicated region fallthrough
CT: control target
= control target key end

     0   :  { %12 = vsyncpa [#allocation3], 0  ;;  %v301_v1 = vmov 0.0   ;;  %vm302_vm0 = vmmov 0   ;;  %s395_s0 = inlined_call_operand.vmem [shape: bf16[16,32], index: 0, kind: input, shape index: {}]   ;;  %s396_s1 = inlined_call_operand.vmem [shape: bf16[32,128], index: 1, kind: input, shape index: {}]   ;;  %s397_s2 = inlined_call_operand.vmem [shape: f32[1,128], index: 2, kind: input, shape index: {}]   ;;  %s398_s3 = inlined_call_operand.vmem [shape: s32[16,1], index: 3, kind: input, shape index: {}]   ;;  %s399_s4 = inlined_call_operand.vmem [shape: f32[16,128], index: 4, kind: output, shape index: {0}]   ;;  %s400_s5 = inlined_call_operand.hbm [shape: f32[1,1], index: 5, kind: output, shape index: {1}]   ;;  %s401_s6 = inlined_call_operand.hbm [shape: f32[1,1], index: 6, kind: output, shape index: {2}]  }
   0x1   :  { %v242_v0 = vld [vmem:[%s396_s1] sm:$0xff]   ;;  %223 = vmatprep.subr.bf16.mxu0 %v301_v1  ;;  %v243_v2 = vld [vmem:[%s396_s1 + $0x8] sm:$0xff]   ;;  %227 = vmatprep.mubr.msk.bf16.mxu0 %vm302_vm0, %v301_v1 }
   0x2   :  { %224 = vmatpush3.bf16.msra.mxu0 %v242_v0  ;;  %v100_v3 = vld [vmem:[%s398_s3] sm:$0xff] }
   0x3   :  { %225 = vmatprep.subr.bf16.mxu0 %v301_v1 }
   0x4   :  { %13 = vsyncpa [#allocation5], 0  ;;  %v303_v4 = vmov 0   ;;  %v244_v5 = vld [vmem:[%s395_s0] sm:$0xff]   ;;  %vm53_vm1 = vcmask 261120   ;;  %v101_v6 = vld [vmem:[%s398_s3 + $0x8] sm:$0xff]  ;;  %v102_v7 = vlaneseq }
   0x5   :  { %240 = vset.pattern.permute.xlu1 %v303_v4  ;;  %241 = vset.pattern.permute.xlu0 %v303_v4  ;;  %v213_v10 = vld [vmem:[%s397_s2] ss:$0 sm:$0xff]  ;;  %vm141_vm5 = vcmp.ne.s32.totalorder %v100_v3, 4294967196  ;;  %vm142_vm6 = vcmp.ne.s32.totalorder %v101_v6, 4294967196  ;;  %vm151_vm7 = vcmask 7168   ;;  %s304_s2 = smov [#allocation2]  }
   0x6   :  { %128 = vperm.xlu1 %240, %v100_v3   ;;  %226 = vmatpush3.bf16.msra.mxu0 %v243_v2  ;;  %v103_v9 = vand.u32 127, %v102_v7  ;;  %v218_v30 = vsel %vm141_vm5, 1.0, %v301_v1  ;;  %v219_v31 = vsel %vm142_vm6, 1.0, %v301_v1  ;;  %vm165_vm8 = vcmask 0   ;;  %s305_s11 = smov [#allocation4]  }
   0x7   :  { %v167_v32 = vsel %vm151_vm7, %v218_v30, 0.0  ;;  %v168_v33 = vsel %vm151_vm7, %v219_v31, 0.0  ;;  %s199_s12 = sshll.u32 %s305_s11, 4  ;;  %s200_s12 = int_to_ptr.vmem [resolvable:$true] %s199_s12 }
   0x8   :  { %vm104_vm3 = vcmp.lt.s32.totalorder %v103_v9, 7  ;;  %v169_v34 = vadd.f32 %v168_v33, %v167_v32 }
   0x9   :  { %228 = vmatmul.mubr.msk.bf16.vlgmr.msra.gmra.mrb[0].mxu0 %vm53_vm1, %v244_v5 }
   0xa   :  { %131 = vperm.xlu1 %240, %v101_v6  }
  0x85   :  { %v129_v8 = vpop.permute.xlu1 %128 }
  0x86   :  { %vm133_vm2 = vcmp.eq.s32.totalorder %v103_v9, %v129_v8 }
  0x89   :  { %v132_v11 = vpop.permute.xlu1 %131 }
  0x8a   :  { %vm134_vm4 = vcmp.eq.s32.totalorder %v103_v9, %v132_v11 }
  0xdc   :  { %v91_v12 = vpop.f32.mrb[0].mxu0 }
  0xdd   :  { %v92_v13 = vadd.f32 %v213_v10, %v91_v12  ;;  %v229_v14 = vpop.f32.mrb[1].mxu0 }
  0xde   :  { %v94_v15 = vpop.f32.mrb[2].mxu0 }
  0xdf   :  { %98 = vst [vmem:[%s399_s4] sm:$0xff] %v92_v13  ;;  %v95_v16 = vadd.f32 %v213_v10, %v94_v15  ;;  %v230_v17 = vpop.f32.mrb[3].mxu0  ;;  %v105_v18 = vsel %vm104_vm3, %v92_v13, -1e+30  ;;  %v135_v19 = vsel %vm133_vm2, %v92_v13, 0.0 }
  0xe0   :  { %107 = vmax.xlane.f32.xlu0 %v105_v18 }
  0xe1   :  { %99 = vst [vmem:[%s399_s4 + $0x8] sm:$0xff] %v95_v16  ;;  %v136_v20 = vsel %vm134_vm4, %v95_v16, 0.0  ;;  %v106_v21 = vsel %vm104_vm3, %v95_v16, -1e+30  ;;  %s189_s4 = sshll.u32 %s304_s2, 4  ;;  %s190_s4 = int_to_ptr.vmem [resolvable:$true] %s189_s4 }
  0xe2   :  { %s253_s13 = scalar_lea.vmem %s190_s4, 16  ;;  %s257_s14 = scalar_lea.vmem %s190_s4, 32 }
  0xe3   :  { %p254_p0 = scmp.ne.s32.totalorder %s190_s4, %s253_s13  ;;  %p258_p1 = scmp.lt.s32.totalorder %s190_s4, %s190_s4 }
  0xe4   :  { %109 = vmax.xlane.f32.xlu0 %v106_v21  ;;  %p259_p2 = scmp.lt.s32.totalorder %s257_s14, %s253_s13 }
  0xe6   :  { %p260_p3 = por %p259_p2, %p258_p1 }
  0xe8   :  { %p261_p4 = pnand %p260_p3, %p254_p0 }
 0x16d   :  { %v108_v22 = vpop.xlane.xlu0 %107 }
 0x16e   :  { %v111_v23 = vsub.f32 %v105_v18, %v108_v22 }
 0x170   :  { %v113_v24 = vmul.f32 1.442695, %v111_v23 }
 0x171   :  { %v110_v25 = vpop.xlane.xlu0 %109 }
 0x172   :  { %245 = vpow2.f32 %v113_v24  ;;  %v112_v26 = vsub.f32 %v106_v21, %v110_v25 }
 0x174   :  { %v115_v27 = vmul.f32 1.442695, %v112_v26 }
 0x176   :  { %247 = vpow2.f32 %v115_v27 }
 0x17c   :  { %v246_v28 = vpop.eup %245 }
 0x17d   :  { %117 = vadd.xlane.f32.xlu0 %v246_v28 }
 0x180   :  { %v248_v29 = vpop.eup %247 }
 0x181   :  { %137 = vadd.xlane.f32.xlu0 %v135_v19  ;;  %119 = vadd.xlane.f32.xlu1 %v248_v29 }
 0x185   :  { %139 = vadd.xlane.f32.xlu0 %v136_v20 }
 0x20a   :  { %v118_v35 = vpop.xlane.xlu0 %117 }
 0x20b   :  { %249 = vlog2.f32 %v118_v35 }
 0x20e   :  { %v120_v36 = vpop.xlane.xlu1 %119  ;;  %v138_v39 = vpop.xlane.xlu0 %137 }
 0x20f   :  { %251 = vlog2.f32 %v120_v36 }
 0x212   :  { %v140_v45 = vpop.xlane.xlu0 %139 }
 0x215   :  { %v250_v37 = vpop.eup %249 }
 0x216   :  { %v122_v38 = vmul.f32 0.6931472, %v250_v37 }
 0x218   :  { %v125_v40 = vadd.f32 %v122_v38, %v108_v22 }
 0x219   :  { %v252_v41 = vpop.eup %251 }
 0x21a   :  { %v124_v42 = vmul.f32 0.6931472, %v252_v41  ;;  %v147_v43 = vsub.f32 %v125_v40, %v138_v39 }
 0x21c   :  { %v126_v44 = vadd.f32 %v124_v42, %v110_v25  ;;  %v149_v46 = vmul.f32 %v218_v30, %v147_v43 }
 0x21e   :  { %v148_v47 = vsub.f32 %v126_v44, %v140_v45  ;;  %v152_v49 = vsel %vm151_vm7, %v149_v46, 0.0 }
 0x220   :  { %v150_v48 = vmul.f32 %v219_v31, %v148_v47 }
 0x222   :  { %v153_v50 = vsel %vm151_vm7, %v150_v48, 0.0 }
 0x223   :  { %v154_v51 = vadd.f32 %v153_v50, %v152_v49 }
 0x225   :  { %155 = vadd.xlane.f32.xlu0 %v154_v51 }
 0x229   :  { %170 = vadd.xlane.f32.xlu0 %v169_v34 }
 0x2b2   :  { %v156_v52 = vpop.xlane.xlu0 %155 }
 0x2b3   :  { %v157_v53 = vrot.slane %v156_v52, 4 }
 0x2b5   :  { %v158_v54 = vadd.f32 %v157_v53, %v156_v52 }
 0x2b6   :  { %v171_v55 = vpop.xlane.xlu0 %170 }
 0x2b7   :  { %v159_v56 = vrot.slane %v158_v54, 2  ;;  %v172_v57 = vrot.slane %v171_v55, 4 }
 0x2b9   :  { %v173_v58 = vadd.f32 %v172_v57, %v171_v55  ;;  %v160_v59 = vadd.f32 %v159_v56, %v158_v54 }
 0x2bb   :  { %v174_v60 = vrot.slane %v173_v58, 2  ;;  %v161_v61 = vrot.slane %v160_v59, 1 }
 0x2bd   :  { %v175_v62 = vadd.f32 %v174_v60, %v173_v58  ;;  %v162_v63 = vadd.f32 %v161_v61, %v160_v59 }
 0x2bf   :  { %231 = vpush %v162_v63  ;;  %v176_v0 = vrot.slane %v175_v62, 1 }
 0x2c1   :  { %v177_v1 = vadd.f32 %v176_v0, %v175_v62 }
 0x2c3   :  { %233 = vpush %v177_v1 }
 0x2f0   :  { %s232_s10 = spop %231 }
 0x2f1   :  { %v164_v2 = vstv %s232_s10 }
 0x2f2   :  { %166 = vst.msk [vmem:[#allocation2] sm:$0x1] %vm165_vm8, %v164_v2 }
 0x2f3   :  { %264 = shalt.err (!%p261_p4)
}
 0x2f4   :  { %s265_s17 = scalar_lea.hbm %s400_s5, 16 }
 0x2f5   :  { %p266_p5 = scmp.ne.s32.totalorder %s400_s5, %s265_s17  ;;  %p269_p6 = scmp.lt.u32.totalorder %s265_s17, %s400_s5 }
 0x2f7   :  { %p271_p7 = pnand %p269_p6, %p266_p5 }
 0x2f9   :  { %274 = shalt.err (!%p271_p7)
}
 0x2fa   :  { %192 = dma.vmem_to_hbm [thread:$0]  %s190_s4, 16, %s400_s5, [#allocation3]  }
 0x2fb   :  { %s234_s24 = spop %233  ;;  %s275_s25 = scalar_lea.vmem %s200_s12, 16 }
 0x2fc   :  { %v179_v3 = vstv %s234_s24  ;;  %p276_p8 = scmp.ne.s32.totalorder %s200_s12, %s275_s25  ;;  %s279_s26 = scalar_lea.vmem %s200_s12, 32 }
 0x2fd   :  { %180 = vst.msk [vmem:[#allocation4] sm:$0x1] %vm165_vm8, %v179_v3  ;;  %p280_p9 = scmp.lt.s32.totalorder %s200_s12, %s200_s12  ;;  %p281_p10 = scmp.lt.s32.totalorder %s279_s26, %s275_s25 }
 0x2ff   :  { %p282_p11 = por %p281_p10, %p280_p9 }
 0x301   :  { %p283_p12 = pnand %p282_p11, %p276_p8 }
 0x303   :  { %286 = shalt.err (!%p283_p12)
}
 0x304   :  { %s287_s29 = scalar_lea.hbm %s401_s6, 16 }
 0x305   :  { %p288_p13 = scmp.ne.s32.totalorder %s401_s6, %s287_s29  ;;  %p291_p0 = scmp.lt.u32.totalorder %s287_s29, %s401_s6 }
 0x307   :  { %p293_p1 = pnand %p291_p0, %p288_p13 }
 0x309   :  { %296 = shalt.err (!%p293_p1)
}
 0x30a   :  { %202 = dma.vmem_to_hbm [thread:$0]  %s200_s12, 16, %s401_s6, [#allocation5]  }
 0x30b   :  { %297 = dma.done.wait [#allocation3], 16  }
 0x30c   :  { %298 = vsyncadd [#allocation3], 4294967280 }
 0x30d   :  { %299 = dma.done.wait [#allocation5], 16  }
 0x30e   :  { %300 = vsyncadd [#allocation5], 4294967280 }
 0x30f   :  { %211 = vsyncpa [#allocation3], 1 }
 0x310   :  { %212 = vsyncpa [#allocation5], 1 }

</bundles_post_ra>
